<compile_context>
chip_gen: v6e
topology: v6e:2x2x1
jax: 0.10.0
libtpu: 0.0.40
codegen_flags: <defaults>
</compile_context>

<pallas_src>
import jax
import jax.numpy as jnp
import numpy as np
from jax.experimental import pallas as pl
from jax.experimental.pallas import tpu as pltpu


def _round_up(x, m):
    return (x + m - 1) // m * m


# ---------------------------------------------------------------------------
# Pallas kernel
# ---------------------------------------------------------------------------
def _make_decoder_kernel(n_layers: int):

    def kernel(*refs):
        f32 = jnp.float32

        # ---- unpack refs --------------------------------------------------
        (ids_ref, emb_tab_ref, hid_ref, enc_ref,
         aWh_ref, aWe_ref, ab_ref, av_ref) = refs[:8]
        pos = 8
        layer_refs = []
        for l in range(n_layers):
            n = 5 if l == 0 else 4
            layer_refs.append(refs[pos:pos + n])
            pos += n
        fcx_ref, fcc_ref, fce_ref, fcb_ref = refs[pos:pos + 4]
        pred_ref, newh_ref = refs[pos + 4:pos + 6]

        enc = enc_ref[...]                                    # [Bp, S, D2]
        Bp, S, D2 = enc.shape
        H = hid_ref.shape[-1]
        V, E = emb_tab_ref.shape

        # ---- fused embedding lookup (one-hot matmul, no XLA gather) -------
        ids = ids_ref[...]                                    # [Bp, 1] int32
        vocab_iota = jax.lax.broadcasted_iota(jnp.int32, (Bp, V), 1)
        onehot = (vocab_iota == ids).astype(f32)              # [Bp, V]
        emb = jnp.dot(onehot, emb_tab_ref[...],
                      preferred_element_type=f32)             # [Bp, E]
        # (embedding dropout omitted: eval-mode identity)

        # ---- additive attention over encoder outputs ----------------------
        h_top = hid_ref[n_layers - 1]                         # [Bp, H]
        # bias folded into the [Bp, H] projection before the [Bp,S,H] bcast
        h_proj = (jnp.dot(h_top, aWh_ref[...],
                          preferred_element_type=f32)
                  + ab_ref[...])                              # [Bp, H]
        enc_proj = jnp.dot(enc.reshape(Bp * S, D2), aWe_ref[...],
                           preferred_element_type=f32).reshape(Bp, S, H)
        energy = jnp.tanh(enc_proj + h_proj[:, None, :])      # [Bp, S, H]
        # scores via VPU multiply + XLU lane-reduce (avoids N=1 MXU pass)
        scores = jnp.sum(energy * av_ref[...][None, :, :], axis=-1)   # [Bp,S]
        scores = scores - jnp.max(scores, axis=1, keepdims=True)
        ex = jnp.exp(scores)
        a = ex / jnp.sum(ex, axis=1, keepdims=True)           # [Bp, S]
        # context = bmm(a, enc) via VPU multiply + sublane reduce
        context = jnp.sum(a[:, :, None] * enc, axis=1)        # [Bp, D2]

        # ---- multi-layer GRU, single timestep (PyTorch gate order r,z,n) --
        x = emb  # placeholder; layer 0 uses (emb, context) directly
        for l in range(n_layers):
            if l == 0:
                wih_e_ref, wih_c_ref, whh_ref, bih_ref, bhh_ref = layer_refs[0]
            else:
                wih_ref, whh_ref, bih_ref, bhh_ref = layer_refs[l]
            h_prev = hid_ref[l]                               # [Bp, H]

            def gate_in(g, _l=l, _x=x):
                if _l == 0:
                    return (jnp.dot(emb, wih_e_ref[g],
                                    preferred_element_type=f32)
                            + jnp.dot(context, wih_c_ref[g],
                                      preferred_element_type=f32)
                            + bih_ref[g])
                return (jnp.dot(_x, wih_ref[g],
                                preferred_element_type=f32) + bih_ref[g])

            def gate_hid(g, _h=h_prev):
                return (jnp.dot(_h, whh_ref[g],
                                preferred_element_type=f32) + bhh_ref[g])

            r = jax.nn.sigmoid(gate_in(0) + gate_hid(0))
            z = jax.nn.sigmoid(gate_in(1) + gate_hid(1))
            n = jnp.tanh(gate_in(2) + r * gate_hid(2))
            h_new = (1.0 - z) * n + z * h_prev
            newh_ref[l] = h_new
            x = h_new
            # TODO(synk): inter-layer GRU dropout omitted (eval semantics).

        # ---- output projection: fc_out(cat(output, context, embedded)) ----
        # expressed as a sum of matmuls (fc_W pre-split in the wrapper)
        pred_ref[...] = (jnp.dot(x, fcx_ref[...], preferred_element_type=f32)
                         + jnp.dot(context, fcc_ref[...],
                                   preferred_element_type=f32)
                         + jnp.dot(emb, fce_ref[...],
                                   preferred_element_type=f32)
                         + fcb_ref[...])

    return kernel


# ---------------------------------------------------------------------------
# Wrapper
# ---------------------------------------------------------------------------
def decoder_with_attention(input_ids, hidden, encoder_outputs, params):
    """input_ids [B] int, hidden [L,B,H] f32, encoder_outputs [B,S,2*EH] f32."""
    L, B, H = hidden.shape
    _, S, D2 = encoder_outputs.shape
    V, E = params["embedding"].shape

    # Pad batch to a sublane multiple and vocab to a lane multiple so every
    # vreg / store is dense (padded rows & columns are sliced off below).
    Bp = _round_up(B, 8)
    Vp = _round_up(V, 128)
    pad_b = Bp - B
    pad_v = Vp - V

    ids = input_ids.astype(jnp.int32).reshape(B, 1)
    if pad_b:
        ids = jnp.pad(ids, ((0, pad_b), (0, 0)))
        hidden_p = jnp.pad(hidden, ((0, 0), (0, pad_b), (0, 0)))
        enc_p = jnp.pad(encoder_outputs, ((0, pad_b), (0, 0), (0, 0)))
    else:
        hidden_p = hidden
        enc_p = encoder_outputs

    fc_x = jnp.pad(params["fc_x"], ((0, 0), (0, pad_v)))
    fc_c = jnp.pad(params["fc_c"], ((0, 0), (0, pad_v)))
    fc_e = jnp.pad(params["fc_e"], ((0, 0), (0, pad_v)))
    fc_b = jnp.pad(params["fc_b"], ((0, 0), (0, pad_v)))

    args = [ids, params["embedding"], hidden_p, enc_p,
            params["attn_Wh"], params["attn_We"],
            params["attn_b"], params["attn_v"],
            params["wih0_emb"], params["wih0_ctx"], params["whh0"],
            params["bih0"], params["bhh0"]]
    for l in range(1, L):
        args += [params[f"wih{l}"], params[f"whh{l}"],
                 params[f"bih{l}"], params[f"bhh{l}"]]
    args += [fc_x, fc_c, fc_e, fc_b]

    kernel = _make_decoder_kernel(L)
    vmem = pltpu.MemorySpace.VMEM
    pred_p, newh_p = pl.pallas_call(
        kernel,
        out_shape=(jax.ShapeDtypeStruct((Bp, Vp), jnp.float32),
                   jax.ShapeDtypeStruct((L, Bp, H), jnp.float32)),
        in_specs=[pl.BlockSpec(memory_space=vmem)] * len(args),
        out_specs=(pl.BlockSpec(memory_space=vmem),
                   pl.BlockSpec(memory_space=vmem)),
        compiler_params=pltpu.CompilerParams(vmem_limit_bytes=64 << 20),
    )(*args)

    return pred_p[:B, :V], newh_p[:, :B, :]


# ---------------------------------------------------------------------------
# Pure-JAX reference (same split-weight parameterization, PyTorch semantics)
# ---------------------------------------------------------------------------
def _reference(input_ids, hidden, enc, params):
    L, B, H = hidden.shape
    emb = params["embedding"][input_ids]                      # [B, E]
    h_top = hidden[-1]

    h_proj = h_top @ params["attn_Wh"]                        # [B, H]
    enc_proj = jnp.einsum("bsd,dh->bsh", enc, params["attn_We"])
    energy = jnp.tanh(enc_proj + h_proj[:, None, :] + params["attn_b"][None])
    scores = jnp.einsum("bsh,h->bs", energy, params["attn_v"][0])
    a = jax.nn.softmax(scores, axis=1)
    context = jnp.einsum("bs,bsd->bd", a, enc)                # [B, D2]

    x = emb
    new_h = []
    for l in range(L):
        h_prev = hidden[l]
        if l == 0:
            gi = [emb @ params["wih0_emb"][g] + context @ params["wih0_ctx"][g]
                  + params["bih0"][g] for g in range(3)]
        else:
            gi = [x @ params[f"wih{l}"][g] + params[f"bih{l}"][g]
                  for g in range(3)]
        gh = [h_prev @ params[f"whh{l}"][g] + params[f"bhh{l}"][g]
              for g in range(3)]
        r = jax.nn.sigmoid(gi[0] + gh[0])
        z = jax.nn.sigmoid(gi[1] + gh[1])
        n = jnp.tanh(gi[2] + r * gh[2])
        h_new = (1.0 - z) * n + z * h_prev
        new_h.append(h_new)
        x = h_new
    pred = (x @ params["fc_x"] + context @ params["fc_c"]
            + emb @ params["fc_e"] + params["fc_b"])
    return pred, jnp.stack(new_h, 0)


# ---------------------------------------------------------------------------
# Main
# ---------------------------------------------------------------------------
if __name__ == "__main__":
    # module hyper-params (small, consistent with the forward pass)
    V = 64        # output_dim (vocab)
    E = 16        # emb_dim
    H = 32        # hidden_dim
    L = 2         # n_layers
    EH = 16       # encoder_hidden_dim -> encoder outputs have 2*EH features
    D2 = 2 * EH
    B = 2         # batch
    S = 8         # src_len

    key = jax.random.PRNGKey(0)
    keys = list(jax.random.split(key, 32))
    kit = iter(keys)

    def init(shape):
        return (0.1 * jax.random.normal(next(kit), shape)).astype(jnp.float32)

    params = {
        "embedding": init((V, E)),
        # additive attention: Linear(H + 2*EH -> H) split into h / enc parts,
        # then v: Linear(H -> 1, bias=False) stored as a [1, H] row.
        "attn_Wh": init((H, H)),
        "attn_We": init((D2, H)),
        "attn_b": init((1, H)),
        "attn_v": init((1, H)),
        # output projection Linear(H + 2*EH + E -> V), split per input source.
        "fc_x": init((H, V)),
        "fc_c": init((D2, V)),
        "fc_e": init((E, V)),
        "fc_b": init((1, V)),
        # GRU layer 0 (input = emb ++ context), gates stacked on leading dim
        # in PyTorch order (r, z, n); all stored [in, out].
        "wih0_emb": init((3, E, H)),
        "wih0_ctx": init((3, D2, H)),
        "whh0": init((3, H, H)),
        "bih0": init((3, 1, H)),
        "bhh0": init((3, 1, H)),
    }
    for l in range(1, L):
        params[f"wih{l}"] = init((3, H, H))
        params[f"whh{l}"] = init((3, H, H))
        params[f"bih{l}"] = init((3, 1, H))
        params[f"bhh{l}"] = init((3, 1, H))

    # example inputs
    input_ids = jax.random.randint(next(kit), (B,), 0, V, dtype=jnp.int32)
    hidden = init((L, B, H))
    encoder_outputs = init((B, S, D2))

    pred, new_hidden = decoder_with_attention(input_ids, hidden,
                                              encoder_outputs, params)
    jax.block_until_ready((pred, new_hidden))

    ref_pred, ref_hidden = _reference(input_ids, hidden, encoder_outputs,
                                      params)
    assert pred.shape == (B, V) and new_hidden.shape == (L, B, H)
    np.testing.assert_allclose(np.asarray(pred), np.asarray(ref_pred),
                               rtol=1e-4, atol=1e-4)
    np.testing.assert_allclose(np.asarray(new_hidden), np.asarray(ref_hidden),
                               rtol=1e-4, atol=1e-4)
    print("KERNEL_OK")
</pallas_src>

<mosaic_0001>
module attributes {stable_mosaic.version = 11 : i64} {
  func.func @kernel(%arg0: memref<8x1xi32, #tpu.memory_space<vmem>>, %arg1: memref<64x16xf32, #tpu.memory_space<vmem>>, %arg2: memref<2x8x32xf32, #tpu.memory_space<vmem>>, %arg3: memref<8x8x32xf32, #tpu.memory_space<vmem>>, %arg4: memref<32x32xf32, #tpu.memory_space<vmem>>, %arg5: memref<32x32xf32, #tpu.memory_space<vmem>>, %arg6: memref<1x32xf32, #tpu.memory_space<vmem>>, %arg7: memref<1x32xf32, #tpu.memory_space<vmem>>, %arg8: memref<3x16x32xf32, #tpu.memory_space<vmem>>, %arg9: memref<3x32x32xf32, #tpu.memory_space<vmem>>, %arg10: memref<3x32x32xf32, #tpu.memory_space<vmem>>, %arg11: memref<3x1x32xf32, #tpu.memory_space<vmem>>, %arg12: memref<3x1x32xf32, #tpu.memory_space<vmem>>, %arg13: memref<3x32x32xf32, #tpu.memory_space<vmem>>, %arg14: memref<3x32x32xf32, #tpu.memory_space<vmem>>, %arg15: memref<3x1x32xf32, #tpu.memory_space<vmem>>, %arg16: memref<3x1x32xf32, #tpu.memory_space<vmem>>, %arg17: memref<32x128xf32, #tpu.memory_space<vmem>>, %arg18: memref<32x128xf32, #tpu.memory_space<vmem>>, %arg19: memref<16x128xf32, #tpu.memory_space<vmem>>, %arg20: memref<1x128xf32, #tpu.memory_space<vmem>>, %arg21: memref<8x128xf32, #tpu.memory_space<vmem>>, %arg22: memref<2x8x32xf32, #tpu.memory_space<vmem>>) attributes {dimension_semantics = [], scalar_prefetch = 0 : i64, scratch_operands = 0 : i64, tpu.core_type = #tpu.core_type<tc>} {
    %c0 = arith.constant 0 : index
    %c0_0 = arith.constant 0 : index
    %c0_1 = arith.constant 0 : index
    %0 = vector.load %arg3[%c0, %c0_0, %c0_1] : memref<8x8x32xf32, #tpu.memory_space<vmem>>, vector<8x8x32xf32>
    %c0_2 = arith.constant 0 : index
    %c0_3 = arith.constant 0 : index
    %1 = vector.load %arg0[%c0_2, %c0_3] : memref<8x1xi32, #tpu.memory_space<vmem>>, vector<8x1xi32>
    %2 = tpu.iota {dimensions = array<i32: 1>} : vector<8x64xi32>
    %3 = vector.broadcast %1 : vector<8x1xi32> to vector<8x64xi32>
    %4 = arith.cmpi eq, %2, %3 : vector<8x64xi32>
    %5 = arith.extui %4 : vector<8x64xi1> to vector<8x64xi32>
    %6 = arith.sitofp %5 : vector<8x64xi32> to vector<8x64xf32>
    %c0_4 = arith.constant 0 : index
    %c0_5 = arith.constant 0 : index
    %7 = vector.load %arg1[%c0_4, %c0_5] : memref<64x16xf32, #tpu.memory_space<vmem>>, vector<64x16xf32>
    %cst = arith.constant dense<0.000000e+00> : vector<8x16xf32>
    %8 = tpu.matmul %6, %7, %cst {dimension_numbers = #tpu.dot_dimension_numbers<[1], [0], [0], [1], [0, 0, 1, 1], [], []>} : vector<8x64xf32>, vector<64x16xf32>, vector<8x16xf32> -> vector<8x16xf32>
    %c1 = arith.constant 1 : index
    %c0_6 = arith.constant 0 : index
    %c0_7 = arith.constant 0 : index
    %9 = vector.load %arg2[%c1, %c0_6, %c0_7] : memref<2x8x32xf32, #tpu.memory_space<vmem>>, vector<1x8x32xf32>
    %10 = vector.shape_cast %9 : vector<1x8x32xf32> to vector<8x32xf32>
    %c0_8 = arith.constant 0 : index
    %c0_9 = arith.constant 0 : index
    %11 = vector.load %arg4[%c0_8, %c0_9] : memref<32x32xf32, #tpu.memory_space<vmem>>, vector<32x32xf32>
    %cst_10 = arith.constant dense<0.000000e+00> : vector<8x32xf32>
    %12 = tpu.matmul %10, %11, %cst_10 {dimension_numbers = #tpu.dot_dimension_numbers<[1], [0], [0], [1], [0, 0, 1, 1], [], []>} : vector<8x32xf32>, vector<32x32xf32>, vector<8x32xf32> -> vector<8x32xf32>
    %c0_11 = arith.constant 0 : index
    %c0_12 = arith.constant 0 : index
    %13 = vector.load %arg6[%c0_11, %c0_12] : memref<1x32xf32, #tpu.memory_space<vmem>>, vector<1x32xf32>
    %14 = vector.broadcast %13 : vector<1x32xf32> to vector<8x32xf32>
    %15 = arith.addf %12, %14 : vector<8x32xf32>
    %16 = vector.shape_cast %0 : vector<8x8x32xf32> to vector<64x32xf32>
    %c0_13 = arith.constant 0 : index
    %c0_14 = arith.constant 0 : index
    %17 = vector.load %arg5[%c0_13, %c0_14] : memref<32x32xf32, #tpu.memory_space<vmem>>, vector<32x32xf32>
    %cst_15 = arith.constant dense<0.000000e+00> : vector<64x32xf32>
    %18 = tpu.matmul %16, %17, %cst_15 {dimension_numbers = #tpu.dot_dimension_numbers<[1], [0], [0], [1], [0, 0, 1, 1], [], []>} : vector<64x32xf32>, vector<32x32xf32>, vector<64x32xf32> -> vector<64x32xf32>
    %19 = vector.shape_cast %18 : vector<64x32xf32> to vector<8x8x32xf32>
    %20 = vector.shape_cast %15 : vector<8x32xf32> to vector<8x1x32xf32>
    %21 = vector.broadcast %20 : vector<8x1x32xf32> to vector<8x8x32xf32>
    %22 = arith.addf %19, %21 : vector<8x8x32xf32>
    %23 = math.tanh %22 : vector<8x8x32xf32>
    %c0_16 = arith.constant 0 : index
    %c0_17 = arith.constant 0 : index
    %24 = vector.load %arg7[%c0_16, %c0_17] : memref<1x32xf32, #tpu.memory_space<vmem>>, vector<1x32xf32>
    %25 = vector.shape_cast %24 : vector<1x32xf32> to vector<1x1x32xf32>
    %26 = vector.broadcast %25 : vector<1x1x32xf32> to vector<8x8x32xf32>
    %27 = arith.mulf %23, %26 : vector<8x8x32xf32>
    %cst_18 = arith.constant dense<0.000000e+00> : vector<8x8xf32>
    %28 = vector.multi_reduction <add>, %27, %cst_18 [2] : vector<8x8x32xf32> to vector<8x8xf32>
    %cst_19 = arith.constant dense<0xFF800000> : vector<8xf32>
    %29 = vector.multi_reduction <maximumf>, %28, %cst_19 [1] : vector<8x8xf32> to vector<8xf32>
    %30 = vector.shape_cast %29 : vector<8xf32> to vector<8x1xf32>
    %31 = vector.broadcast %30 : vector<8x1xf32> to vector<8x8xf32>
    %32 = arith.subf %28, %31 : vector<8x8xf32>
    %33 = math.exp %32 : vector<8x8xf32>
    %cst_20 = arith.constant dense<0.000000e+00> : vector<8xf32>
    %34 = vector.multi_reduction <add>, %33, %cst_20 [1] : vector<8x8xf32> to vector<8xf32>
    %35 = vector.shape_cast %34 : vector<8xf32> to vector<8x1xf32>
    %36 = vector.broadcast %35 : vector<8x1xf32> to vector<8x8xf32>
    %37 = arith.divf %33, %36 : vector<8x8xf32>
    %38 = vector.shape_cast %37 : vector<8x8xf32> to vector<8x8x1xf32>
    %39 = vector.broadcast %38 : vector<8x8x1xf32> to vector<8x8x32xf32>
    %40 = arith.mulf %39, %0 : vector<8x8x32xf32>
    %cst_21 = arith.constant dense<0.000000e+00> : vector<8x32xf32>
    %41 = vector.multi_reduction <add>, %40, %cst_21 [1] : vector<8x8x32xf32> to vector<8x32xf32>
    %c0_22 = arith.constant 0 : index
    %c0_23 = arith.constant 0 : index
    %c0_24 = arith.constant 0 : index
    %42 = vector.load %arg2[%c0_22, %c0_23, %c0_24] : memref<2x8x32xf32, #tpu.memory_space<vmem>>, vector<1x8x32xf32>
    %43 = vector.shape_cast %42 : vector<1x8x32xf32> to vector<8x32xf32>
    %c0_25 = arith.constant 0 : index
    %c0_26 = arith.constant 0 : index
    %c0_27 = arith.constant 0 : index
    %44 = vector.load %arg8[%c0_25, %c0_26, %c0_27] : memref<3x16x32xf32, #tpu.memory_space<vmem>>, vector<1x16x32xf32>
    %45 = vector.shape_cast %44 : vector<1x16x32xf32> to vector<16x32xf32>
    %cst_28 = arith.constant dense<0.000000e+00> : vector<8x32xf32>
    %46 = tpu.matmul %8, %45, %cst_28 {dimension_numbers = #tpu.dot_dimension_numbers<[1], [0], [0], [1], [0, 0, 1, 1], [], []>} : vector<8x16xf32>, vector<16x32xf32>, vector<8x32xf32> -> vector<8x32xf32>
    %c0_29 = arith.constant 0 : index
    %c0_30 = arith.constant 0 : index
    %c0_31 = arith.constant 0 : index
    %47 = vector.load %arg9[%c0_29, %c0_30, %c0_31] : memref<3x32x32xf32, #tpu.memory_space<vmem>>, vector<1x32x32xf32>
    %48 = vector.shape_cast %47 : vector<1x32x32xf32> to vector<32x32xf32>
    %cst_32 = arith.constant dense<0.000000e+00> : vector<8x32xf32>
    %49 = tpu.matmul %41, %48, %cst_32 {dimension_numbers = #tpu.dot_dimension_numbers<[1], [0], [0], [1], [0, 0, 1, 1], [], []>} : vector<8x32xf32>, vector<32x32xf32>, vector<8x32xf32> -> vector<8x32xf32>
    %50 = arith.addf %46, %49 : vector<8x32xf32>
    %c0_33 = arith.constant 0 : index
    %c0_34 = arith.constant 0 : index
    %c0_35 = arith.constant 0 : index
    %51 = vector.load %arg11[%c0_33, %c0_34, %c0_35] : memref<3x1x32xf32, #tpu.memory_space<vmem>>, vector<1x1x32xf32>
    %52 = vector.shape_cast %51 : vector<1x1x32xf32> to vector<1x32xf32>
    %53 = vector.broadcast %52 : vector<1x32xf32> to vector<8x32xf32>
    %54 = arith.addf %50, %53 : vector<8x32xf32>
    %c0_36 = arith.constant 0 : index
    %c0_37 = arith.constant 0 : index
    %c0_38 = arith.constant 0 : index
    %55 = vector.load %arg10[%c0_36, %c0_37, %c0_38] : memref<3x32x32xf32, #tpu.memory_space<vmem>>, vector<1x32x32xf32>
    %56 = vector.shape_cast %55 : vector<1x32x32xf32> to vector<32x32xf32>
    %cst_39 = arith.constant dense<0.000000e+00> : vector<8x32xf32>
    %57 = tpu.matmul %43, %56, %cst_39 {dimension_numbers = #tpu.dot_dimension_numbers<[1], [0], [0], [1], [0, 0, 1, 1], [], []>} : vector<8x32xf32>, vector<32x32xf32>, vector<8x32xf32> -> vector<8x32xf32>
    %c0_40 = arith.constant 0 : index
    %c0_41 = arith.constant 0 : index
    %c0_42 = arith.constant 0 : index
    %58 = vector.load %arg12[%c0_40, %c0_41, %c0_42] : memref<3x1x32xf32, #tpu.memory_space<vmem>>, vector<1x1x32xf32>
    %59 = vector.shape_cast %58 : vector<1x1x32xf32> to vector<1x32xf32>
    %60 = vector.broadcast %59 : vector<1x32xf32> to vector<8x32xf32>
    %61 = arith.addf %57, %60 : vector<8x32xf32>
    %62 = arith.addf %54, %61 : vector<8x32xf32>
    %63 = arith.negf %62 : vector<8x32xf32>
    %64 = math.exp %63 : vector<8x32xf32>
    %cst_43 = arith.constant 1.000000e+00 : f32
    %65 = vector.broadcast %cst_43 : f32 to vector<8x32xf32>
    %66 = arith.addf %65, %64 : vector<8x32xf32>
    %67 = arith.divf %65, %66 : vector<8x32xf32>
    %c1_44 = arith.constant 1 : index
    %c0_45 = arith.constant 0 : index
    %c0_46 = arith.constant 0 : index
    %68 = vector.load %arg8[%c1_44, %c0_45, %c0_46] : memref<3x16x32xf32, #tpu.memory_space<vmem>>, vector<1x16x32xf32>
    %69 = vector.shape_cast %68 : vector<1x16x32xf32> to vector<16x32xf32>
    %cst_47 = arith.constant dense<0.000000e+00> : vector<8x32xf32>
    %70 = tpu.matmul %8, %69, %cst_47 {dimension_numbers = #tpu.dot_dimension_numbers<[1], [0], [0], [1], [0, 0, 1, 1], [], []>} : vector<8x16xf32>, vector<16x32xf32>, vector<8x32xf32> -> vector<8x32xf32>
    %c1_48 = arith.constant 1 : index
    %c0_49 = arith.constant 0 : index
    %c0_50 = arith.constant 0 : index
    %71 = vector.load %arg9[%c1_48, %c0_49, %c0_50] : memref<3x32x32xf32, #tpu.memory_space<vmem>>, vector<1x32x32xf32>
    %72 = vector.shape_cast %71 : vector<1x32x32xf32> to vector<32x32xf32>
    %cst_51 = arith.constant dense<0.000000e+00> : vector<8x32xf32>
    %73 = tpu.matmul %41, %72, %cst_51 {dimension_numbers = #tpu.dot_dimension_numbers<[1], [0], [0], [1], [0, 0, 1, 1], [], []>} : vector<8x32xf32>, vector<32x32xf32>, vector<8x32xf32> -> vector<8x32xf32>
    %74 = arith.addf %70, %73 : vector<8x32xf32>
    %c1_52 = arith.constant 1 : index
    %c0_53 = arith.constant 0 : index
    %c0_54 = arith.constant 0 : index
    %75 = vector.load %arg11[%c1_52, %c0_53, %c0_54] : memref<3x1x32xf32, #tpu.memory_space<vmem>>, vector<1x1x32xf32>
    %76 = vector.shape_cast %75 : vector<1x1x32xf32> to vector<1x32xf32>
    %77 = vector.broadcast %76 : vector<1x32xf32> to vector<8x32xf32>
    %78 = arith.addf %74, %77 : vector<8x32xf32>
    %c1_55 = arith.constant 1 : index
    %c0_56 = arith.constant 0 : index
    %c0_57 = arith.constant 0 : index
    %79 = vector.load %arg10[%c1_55, %c0_56, %c0_57] : memref<3x32x32xf32, #tpu.memory_space<vmem>>, vector<1x32x32xf32>
    %80 = vector.shape_cast %79 : vector<1x32x32xf32> to vector<32x32xf32>
    %cst_58 = arith.constant dense<0.000000e+00> : vector<8x32xf32>
    %81 = tpu.matmul %43, %80, %cst_58 {dimension_numbers = #tpu.dot_dimension_numbers<[1], [0], [0], [1], [0, 0, 1, 1], [], []>} : vector<8x32xf32>, vector<32x32xf32>, vector<8x32xf32> -> vector<8x32xf32>
    %c1_59 = arith.constant 1 : index
    %c0_60 = arith.constant 0 : index
    %c0_61 = arith.constant 0 : index
    %82 = vector.load %arg12[%c1_59, %c0_60, %c0_61] : memref<3x1x32xf32, #tpu.memory_space<vmem>>, vector<1x1x32xf32>
    %83 = vector.shape_cast %82 : vector<1x1x32xf32> to vector<1x32xf32>
    %84 = vector.broadcast %83 : vector<1x32xf32> to vector<8x32xf32>
    %85 = arith.addf %81, %84 : vector<8x32xf32>
    %86 = arith.addf %78, %85 : vector<8x32xf32>
    %87 = arith.negf %86 : vector<8x32xf32>
    %88 = math.exp %87 : vector<8x32xf32>
    %cst_62 = arith.constant 1.000000e+00 : f32
    %89 = vector.broadcast %cst_62 : f32 to vector<8x32xf32>
    %90 = arith.addf %89, %88 : vector<8x32xf32>
    %91 = arith.divf %89, %90 : vector<8x32xf32>
    %c2 = arith.constant 2 : index
    %c0_63 = arith.constant 0 : index
    %c0_64 = arith.constant 0 : index
    %92 = vector.load %arg8[%c2, %c0_63, %c0_64] : memref<3x16x32xf32, #tpu.memory_space<vmem>>, vector<1x16x32xf32>
    %93 = vector.shape_cast %92 : vector<1x16x32xf32> to vector<16x32xf32>
    %cst_65 = arith.constant dense<0.000000e+00> : vector<8x32xf32>
    %94 = tpu.matmul %8, %93, %cst_65 {dimension_numbers = #tpu.dot_dimension_numbers<[1], [0], [0], [1], [0, 0, 1, 1], [], []>} : vector<8x16xf32>, vector<16x32xf32>, vector<8x32xf32> -> vector<8x32xf32>
    %c2_66 = arith.constant 2 : index
    %c0_67 = arith.constant 0 : index
    %c0_68 = arith.constant 0 : index
    %95 = vector.load %arg9[%c2_66, %c0_67, %c0_68] : memref<3x32x32xf32, #tpu.memory_space<vmem>>, vector<1x32x32xf32>
    %96 = vector.shape_cast %95 : vector<1x32x32xf32> to vector<32x32xf32>
    %cst_69 = arith.constant dense<0.000000e+00> : vector<8x32xf32>
    %97 = tpu.matmul %41, %96, %cst_69 {dimension_numbers = #tpu.dot_dimension_numbers<[1], [0], [0], [1], [0, 0, 1, 1], [], []>} : vector<8x32xf32>, vector<32x32xf32>, vector<8x32xf32> -> vector<8x32xf32>
    %98 = arith.addf %94, %97 : vector<8x32xf32>
    %c2_70 = arith.constant 2 : index
    %c0_71 = arith.constant 0 : index
    %c0_72 = arith.constant 0 : index
    %99 = vector.load %arg11[%c2_70, %c0_71, %c0_72] : memref<3x1x32xf32, #tpu.memory_space<vmem>>, vector<1x1x32xf32>
    %100 = vector.shape_cast %99 : vector<1x1x32xf32> to vector<1x32xf32>
    %101 = vector.broadcast %100 : vector<1x32xf32> to vector<8x32xf32>
    %102 = arith.addf %98, %101 : vector<8x32xf32>
    %c2_73 = arith.constant 2 : index
    %c0_74 = arith.constant 0 : index
    %c0_75 = arith.constant 0 : index
    %103 = vector.load %arg10[%c2_73, %c0_74, %c0_75] : memref<3x32x32xf32, #tpu.memory_space<vmem>>, vector<1x32x32xf32>
    %104 = vector.shape_cast %103 : vector<1x32x32xf32> to vector<32x32xf32>
    %cst_76 = arith.constant dense<0.000000e+00> : vector<8x32xf32>
    %105 = tpu.matmul %43, %104, %cst_76 {dimension_numbers = #tpu.dot_dimension_numbers<[1], [0], [0], [1], [0, 0, 1, 1], [], []>} : vector<8x32xf32>, vector<32x32xf32>, vector<8x32xf32> -> vector<8x32xf32>
    %c2_77 = arith.constant 2 : index
    %c0_78 = arith.constant 0 : index
    %c0_79 = arith.constant 0 : index
    %106 = vector.load %arg12[%c2_77, %c0_78, %c0_79] : memref<3x1x32xf32, #tpu.memory_space<vmem>>, vector<1x1x32xf32>
    %107 = vector.shape_cast %106 : vector<1x1x32xf32> to vector<1x32xf32>
    %108 = vector.broadcast %107 : vector<1x32xf32> to vector<8x32xf32>
    %109 = arith.addf %105, %108 : vector<8x32xf32>
    %110 = arith.mulf %67, %109 : vector<8x32xf32>
    %111 = arith.addf %102, %110 : vector<8x32xf32>
    %112 = math.tanh %111 : vector<8x32xf32>
    %cst_80 = arith.constant 1.000000e+00 : f32
    %113 = vector.broadcast %cst_80 : f32 to vector<8x32xf32>
    %114 = arith.subf %113, %91 : vector<8x32xf32>
    %115 = arith.mulf %114, %112 : vector<8x32xf32>
    %116 = arith.mulf %91, %43 : vector<8x32xf32>
    %117 = arith.addf %115, %116 : vector<8x32xf32>
    %c0_81 = arith.constant 0 : index
    %c0_82 = arith.constant 0 : index
    %c0_83 = arith.constant 0 : index
    %118 = vector.load %arg22[%c0_81, %c0_82, %c0_83] : memref<2x8x32xf32, #tpu.memory_space<vmem>>, vector<1x8x32xf32>
    %119 = vector.shape_cast %118 : vector<1x8x32xf32> to vector<8x32xf32>
    %120 = vector.shape_cast %117 : vector<8x32xf32> to vector<1x8x32xf32>
    tpu.vector_store %arg22[%c0_81, %c0_82, %c0_83], %120 {strides = array<i32>} : memref<2x8x32xf32, #tpu.memory_space<vmem>>, vector<1x8x32xf32>,
    %c1_84 = arith.constant 1 : index
    %c0_85 = arith.constant 0 : index
    %c0_86 = arith.constant 0 : index
    %121 = vector.load %arg2[%c1_84, %c0_85, %c0_86] : memref<2x8x32xf32, #tpu.memory_space<vmem>>, vector<1x8x32xf32>
    %122 = vector.shape_cast %121 : vector<1x8x32xf32> to vector<8x32xf32>
    %c0_87 = arith.constant 0 : index
    %c0_88 = arith.constant 0 : index
    %c0_89 = arith.constant 0 : index
    %123 = vector.load %arg13[%c0_87, %c0_88, %c0_89] : memref<3x32x32xf32, #tpu.memory_space<vmem>>, vector<1x32x32xf32>
    %124 = vector.shape_cast %123 : vector<1x32x32xf32> to vector<32x32xf32>
    %cst_90 = arith.constant dense<0.000000e+00> : vector<8x32xf32>
    %125 = tpu.matmul %117, %124, %cst_90 {dimension_numbers = #tpu.dot_dimension_numbers<[1], [0], [0], [1], [0, 0, 1, 1], [], []>} : vector<8x32xf32>, vector<32x32xf32>, vector<8x32xf32> -> vector<8x32xf32>
    %c0_91 = arith.constant 0 : index
    %c0_92 = arith.constant 0 : index
    %c0_93 = arith.constant 0 : index
    %126 = vector.load %arg15[%c0_91, %c0_92, %c0_93] : memref<3x1x32xf32, #tpu.memory_space<vmem>>, vector<1x1x32xf32>
    %127 = vector.shape_cast %126 : vector<1x1x32xf32> to vector<1x32xf32>
    %128 = vector.broadcast %127 : vector<1x32xf32> to vector<8x32xf32>
    %129 = arith.addf %125, %128 : vector<8x32xf32>
    %c0_94 = arith.constant 0 : index
    %c0_95 = arith.constant 0 : index
    %c0_96 = arith.constant 0 : index
    %130 = vector.load %arg14[%c0_94, %c0_95, %c0_96] : memref<3x32x32xf32, #tpu.memory_space<vmem>>, vector<1x32x32xf32>
    %131 = vector.shape_cast %130 : vector<1x32x32xf32> to vector<32x32xf32>
    %cst_97 = arith.constant dense<0.000000e+00> : vector<8x32xf32>
    %132 = tpu.matmul %122, %131, %cst_97 {dimension_numbers = #tpu.dot_dimension_numbers<[1], [0], [0], [1], [0, 0, 1, 1], [], []>} : vector<8x32xf32>, vector<32x32xf32>, vector<8x32xf32> -> vector<8x32xf32>
    %c0_98 = arith.constant 0 : index
    %c0_99 = arith.constant 0 : index
    %c0_100 = arith.constant 0 : index
    %133 = vector.load %arg16[%c0_98, %c0_99, %c0_100] : memref<3x1x32xf32, #tpu.memory_space<vmem>>, vector<1x1x32xf32>
    %134 = vector.shape_cast %133 : vector<1x1x32xf32> to vector<1x32xf32>
    %135 = vector.broadcast %134 : vector<1x32xf32> to vector<8x32xf32>
    %136 = arith.addf %132, %135 : vector<8x32xf32>
    %137 = arith.addf %129, %136 : vector<8x32xf32>
    %138 = arith.negf %137 : vector<8x32xf32>
    %139 = math.exp %138 : vector<8x32xf32>
    %cst_101 = arith.constant 1.000000e+00 : f32
    %140 = vector.broadcast %cst_101 : f32 to vector<8x32xf32>
    %141 = arith.addf %140, %139 : vector<8x32xf32>
    %142 = arith.divf %140, %141 : vector<8x32xf32>
    %c1_102 = arith.constant 1 : index
    %c0_103 = arith.constant 0 : index
    %c0_104 = arith.constant 0 : index
    %143 = vector.load %arg13[%c1_102, %c0_103, %c0_104] : memref<3x32x32xf32, #tpu.memory_space<vmem>>, vector<1x32x32xf32>
    %144 = vector.shape_cast %143 : vector<1x32x32xf32> to vector<32x32xf32>
    %cst_105 = arith.constant dense<0.000000e+00> : vector<8x32xf32>
    %145 = tpu.matmul %117, %144, %cst_105 {dimension_numbers = #tpu.dot_dimension_numbers<[1], [0], [0], [1], [0, 0, 1, 1], [], []>} : vector<8x32xf32>, vector<32x32xf32>, vector<8x32xf32> -> vector<8x32xf32>
    %c1_106 = arith.constant 1 : index
    %c0_107 = arith.constant 0 : index
    %c0_108 = arith.constant 0 : index
    %146 = vector.load %arg15[%c1_106, %c0_107, %c0_108] : memref<3x1x32xf32, #tpu.memory_space<vmem>>, vector<1x1x32xf32>
    %147 = vector.shape_cast %146 : vector<1x1x32xf32> to vector<1x32xf32>
    %148 = vector.broadcast %147 : vector<1x32xf32> to vector<8x32xf32>
    %149 = arith.addf %145, %148 : vector<8x32xf32>
    %c1_109 = arith.constant 1 : index
    %c0_110 = arith.constant 0 : index
    %c0_111 = arith.constant 0 : index
    %150 = vector.load %arg14[%c1_109, %c0_110, %c0_111] : memref<3x32x32xf32, #tpu.memory_space<vmem>>, vector<1x32x32xf32>
    %151 = vector.shape_cast %150 : vector<1x32x32xf32> to vector<32x32xf32>
    %cst_112 = arith.constant dense<0.000000e+00> : vector<8x32xf32>
    %152 = tpu.matmul %122, %151, %cst_112 {dimension_numbers = #tpu.dot_dimension_numbers<[1], [0], [0], [1], [0, 0, 1, 1], [], []>} : vector<8x32xf32>, vector<32x32xf32>, vector<8x32xf32> -> vector<8x32xf32>
    %c1_113 = arith.constant 1 : index
    %c0_114 = arith.constant 0 : index
    %c0_115 = arith.constant 0 : index
    %153 = vector.load %arg16[%c1_113, %c0_114, %c0_115] : memref<3x1x32xf32, #tpu.memory_space<vmem>>, vector<1x1x32xf32>
    %154 = vector.shape_cast %153 : vector<1x1x32xf32> to vector<1x32xf32>
    %155 = vector.broadcast %154 : vector<1x32xf32> to vector<8x32xf32>
    %156 = arith.addf %152, %155 : vector<8x32xf32>
    %157 = arith.addf %149, %156 : vector<8x32xf32>
    %158 = arith.negf %157 : vector<8x32xf32>
    %159 = math.exp %158 : vector<8x32xf32>
    %cst_116 = arith.constant 1.000000e+00 : f32
    %160 = vector.broadcast %cst_116 : f32 to vector<8x32xf32>
    %161 = arith.addf %160, %159 : vector<8x32xf32>
    %162 = arith.divf %160, %161 : vector<8x32xf32>
    %c2_117 = arith.constant 2 : index
    %c0_118 = arith.constant 0 : index
    %c0_119 = arith.constant 0 : index
    %163 = vector.load %arg13[%c2_117, %c0_118, %c0_119] : memref<3x32x32xf32, #tpu.memory_space<vmem>>, vector<1x32x32xf32>
    %164 = vector.shape_cast %163 : vector<1x32x32xf32> to vector<32x32xf32>
    %cst_120 = arith.constant dense<0.000000e+00> : vector<8x32xf32>
    %165 = tpu.matmul %117, %164, %cst_120 {dimension_numbers = #tpu.dot_dimension_numbers<[1], [0], [0], [1], [0, 0, 1, 1], [], []>} : vector<8x32xf32>, vector<32x32xf32>, vector<8x32xf32> -> vector<8x32xf32>
    %c2_121 = arith.constant 2 : index
    %c0_122 = arith.constant 0 : index
    %c0_123 = arith.constant 0 : index
    %166 = vector.load %arg15[%c2_121, %c0_122, %c0_123] : memref<3x1x32xf32, #tpu.memory_space<vmem>>, vector<1x1x32xf32>
    %167 = vector.shape_cast %166 : vector<1x1x32xf32> to vector<1x32xf32>
    %168 = vector.broadcast %167 : vector<1x32xf32> to vector<8x32xf32>
    %169 = arith.addf %165, %168 : vector<8x32xf32>
    %c2_124 = arith.constant 2 : index
    %c0_125 = arith.constant 0 : index
    %c0_126 = arith.constant 0 : index
    %170 = vector.load %arg14[%c2_124, %c0_125, %c0_126] : memref<3x32x32xf32, #tpu.memory_space<vmem>>, vector<1x32x32xf32>
    %171 = vector.shape_cast %170 : vector<1x32x32xf32> to vector<32x32xf32>
    %cst_127 = arith.constant dense<0.000000e+00> : vector<8x32xf32>
    %172 = tpu.matmul %122, %171, %cst_127 {dimension_numbers = #tpu.dot_dimension_numbers<[1], [0], [0], [1], [0, 0, 1, 1], [], []>} : vector<8x32xf32>, vector<32x32xf32>, vector<8x32xf32> -> vector<8x32xf32>
    %c2_128 = arith.constant 2 : index
    %c0_129 = arith.constant 0 : index
    %c0_130 = arith.constant 0 : index
    %173 = vector.load %arg16[%c2_128, %c0_129, %c0_130] : memref<3x1x32xf32, #tpu.memory_space<vmem>>, vector<1x1x32xf32>
    %174 = vector.shape_cast %173 : vector<1x1x32xf32> to vector<1x32xf32>
    %175 = vector.broadcast %174 : vector<1x32xf32> to vector<8x32xf32>
    %176 = arith.addf %172, %175 : vector<8x32xf32>
    %177 = arith.mulf %142, %176 : vector<8x32xf32>
    %178 = arith.addf %169, %177 : vector<8x32xf32>
    %179 = math.tanh %178 : vector<8x32xf32>
    %cst_131 = arith.constant 1.000000e+00 : f32
    %180 = vector.broadcast %cst_131 : f32 to vector<8x32xf32>
    %181 = arith.subf %180, %162 : vector<8x32xf32>
    %182 = arith.mulf %181, %179 : vector<8x32xf32>
    %183 = arith.mulf %162, %122 : vector<8x32xf32>
    %184 = arith.addf %182, %183 : vector<8x32xf32>
    %c1_132 = arith.constant 1 : index
    %c0_133 = arith.constant 0 : index
    %c0_134 = arith.constant 0 : index
    %185 = vector.load %arg22[%c1_132, %c0_133, %c0_134] : memref<2x8x32xf32, #tpu.memory_space<vmem>>, vector<1x8x32xf32>
    %186 = vector.shape_cast %185 : vector<1x8x32xf32> to vector<8x32xf32>
    %187 = vector.shape_cast %184 : vector<8x32xf32> to vector<1x8x32xf32>
    tpu.vector_store %arg22[%c1_132, %c0_133, %c0_134], %187 {strides = array<i32>} : memref<2x8x32xf32, #tpu.memory_space<vmem>>, vector<1x8x32xf32>,
    %c0_135 = arith.constant 0 : index
    %c0_136 = arith.constant 0 : index
    %188 = vector.load %arg17[%c0_135, %c0_136] : memref<32x128xf32, #tpu.memory_space<vmem>>, vector<32x128xf32>
    %cst_137 = arith.constant dense<0.000000e+00> : vector<8x128xf32>
    %189 = tpu.matmul %184, %188, %cst_137 {dimension_numbers = #tpu.dot_dimension_numbers<[1], [0], [0], [1], [0, 0, 1, 1], [], []>} : vector<8x32xf32>, vector<32x128xf32>, vector<8x128xf32> -> vector<8x128xf32>
    %c0_138 = arith.constant 0 : index
    %c0_139 = arith.constant 0 : index
    %190 = vector.load %arg18[%c0_138, %c0_139] : memref<32x128xf32, #tpu.memory_space<vmem>>, vector<32x128xf32>
    %cst_140 = arith.constant dense<0.000000e+00> : vector<8x128xf32>
    %191 = tpu.matmul %41, %190, %cst_140 {dimension_numbers = #tpu.dot_dimension_numbers<[1], [0], [0], [1], [0, 0, 1, 1], [], []>} : vector<8x32xf32>, vector<32x128xf32>, vector<8x128xf32> -> vector<8x128xf32>
    %192 = arith.addf %189, %191 : vector<8x128xf32>
    %c0_141 = arith.constant 0 : index
    %c0_142 = arith.constant 0 : index
    %193 = vector.load %arg19[%c0_141, %c0_142] : memref<16x128xf32, #tpu.memory_space<vmem>>, vector<16x128xf32>
    %cst_143 = arith.constant dense<0.000000e+00> : vector<8x128xf32>
    %194 = tpu.matmul %8, %193, %cst_143 {dimension_numbers = #tpu.dot_dimension_numbers<[1], [0], [0], [1], [0, 0, 1, 1], [], []>} : vector<8x16xf32>, vector<16x128xf32>, vector<8x128xf32> -> vector<8x128xf32>
    %195 = arith.addf %192, %194 : vector<8x128xf32>
    %c0_144 = arith.constant 0 : index
    %c0_145 = arith.constant 0 : index
    %196 = vector.load %arg20[%c0_144, %c0_145] : memref<1x128xf32, #tpu.memory_space<vmem>>, vector<1x128xf32>
    %197 = vector.broadcast %196 : vector<1x128xf32> to vector<8x128xf32>
    %198 = arith.addf %195, %197 : vector<8x128xf32>
    %c0_146 = arith.constant 0 : index
    %c0_147 = arith.constant 0 : index
    %199 = vector.load %arg21[%c0_146, %c0_147] : memref<8x128xf32, #tpu.memory_space<vmem>>, vector<8x128xf32>
    tpu.vector_store %arg21[%c0_146, %c0_147], %198 {strides = array<i32>} : memref<8x128xf32, #tpu.memory_space<vmem>>, vector<8x128xf32>,
    return
  }
}

</mosaic_0001>

<bundles_post_ra>
// kernel: tpu_custom_call.1
= control target key start
LH: loop header
LB: loop body
LE: loop exit
PB: predicated region body
PF: predicated region fallthrough
CT: control target
= control target key end

     0   :  { %s4176_s0 = inlined_call_operand.vmem [shape: s32[8,1], index: 0, kind: input, shape index: {}]   ;;  %s4177_s1 = inlined_call_operand.vmem [shape: f32[64,16], index: 1, kind: input, shape index: {}]   ;;  %s4178_s2 = inlined_call_operand.hbm [shape: f32[2,8,32], index: 2, kind: input, shape index: {}]   ;;  %s4179_s3 = inlined_call_operand.hbm [shape: f32[8,8,32], index: 3, kind: input, shape index: {}]   ;;  %s4180_s4 = inlined_call_operand.hbm [shape: f32[32,32], index: 4, kind: input, shape index: {}]   ;;  %s4181_s5 = inlined_call_operand.hbm [shape: f32[32,32], index: 5, kind: input, shape index: {}]   ;;  %s4182_s6 = inlined_call_operand.hbm [shape: f32[1,32], index: 6, kind: input, shape index: {}]   ;;  %s4183_s7 = inlined_call_operand.hbm [shape: f32[1,32], index: 7, kind: input, shape index: {}]   ;;  %s4184_s8 = inlined_call_operand.hbm [shape: f32[3,16,32], index: 8, kind: input, shape index: {}]   ;;  %s4185_s9 = inlined_call_operand.vmem [shape: f32[3,32,32], index: 9, kind: input, shape index: {}]   ;;  %s4186_s10 = inlined_call_operand.hbm [shape: f32[3,32,32], index: 10, kind: input, shape index: {}]   ;;  %s4187_s11 = inlined_call_operand.hbm [shape: f32[3,1,32], index: 11, kind: input, shape index: {}]   ;;  %s4188_s12 = inlined_call_operand.hbm [shape: f32[3,1,32], index: 12, kind: input, shape index: {}]   ;;  %s4189_s13 = inlined_call_operand.hbm [shape: f32[3,32,32], index: 13, kind: input, shape index: {}]   ;;  %s4190_s14 = inlined_call_operand.hbm [shape: f32[3,32,32], index: 14, kind: input, shape index: {}]   ;;  %s4191_s15 = inlined_call_operand.vmem [shape: f32[3,1,32], index: 15, kind: input, shape index: {}]   ;;  %s4192_s16 = inlined_call_operand.vmem [shape: f32[3,1,32], index: 16, kind: input, shape index: {}]   ;;  %s4193_s17 = inlined_call_operand.hbm [shape: f32[32,128], index: 17, kind: input, shape index: {}]   ;;  %s4194_s18 = inlined_call_operand.hbm [shape: f32[32,128], index: 18, kind: input, shape index: {}]   ;;  %s4195_s19 = inlined_call_operand.vmem [shape: f32[16,128], index: 19, kind: input, shape index: {}]   ;;  %s4196_s20 = inlined_call_operand.vmem [shape: f32[1,128], index: 20, kind: input, shape index: {}]   ;;  %s4197_s21 = inlined_call_operand.hbm [shape: f32[8,128], index: 21, kind: output, shape index: {0}]   ;;  %s4198_s22 = inlined_call_operand.hbm [shape: f32[2,8,32], index: 22, kind: output, shape index: {1}]  }
   0x1   :  { %4200 = sst [smem:[#allocation38_spill]] %s4176_s0 }
   0x2   :  { %4201 = sst [smem:[#allocation39_spill]] %s4177_s1 }
   0x3   :  { %4202 = sst [smem:[#allocation40_spill]] %s4178_s2 }
   0x4   :  { %4203 = sst [smem:[#allocation41_spill]] %s4179_s3 }
   0x5   :  { %4204 = sst [smem:[#allocation42_spill]] %s4180_s4 }
   0x6   :  { %4205 = sst [smem:[#allocation43_spill]] %s4181_s5 }
   0x7   :  { %4206 = sst [smem:[#allocation44_spill]] %s4182_s6 }
   0x8   :  { %28 = vsyncpa [#allocation3], 0 }
   0x9   :  { %29 = vsyncpa [#allocation6], 0 }
   0xa   :  { %30 = vsyncpa [#allocation9], 0 }
   0xb   :  { %31 = vsyncpa [#allocation12], 0 }
   0xc   :  { %32 = vsyncpa [#allocation15], 0 }
   0xd   :  { %33 = vsyncpa [#allocation18], 0 }
   0xe   :  { %34 = vsyncpa [#allocation21], 0 }
   0xf   :  { %35 = vsyncpa [#allocation24], 0 }
  0x10   :  { %36 = vsyncpa [#allocation4], 0 }
  0x11   :  { %37 = vsyncpa [#allocation27], 0  ;;  %s3473_s3 = smov [#allocation5]   ;;  %s3474_s29 = smov [#allocation8]  }
  0x12   :  { %s59_s28 = sshll.u32 %s3473_s3, 4  ;;  %s83_s30 = sshll.u32 %s3474_s29, 4  ;;  %s60_s28 = int_to_ptr.vmem [resolvable:$true] %s59_s28  ;;  %s84_s30 = int_to_ptr.vmem [resolvable:$true] %s83_s30 }
  0x13   :  { %s3141_s4 = scalar_lea.vmem %s60_s28, 1024  ;;  %p3146_p1 = scmp.lt.s32.totalorder %s60_s28, %s60_s28 }
  0x14   :  { %p3142_p0 = scmp.ne.s32.totalorder %s60_s28, %s3141_s4  ;;  %p3147_p2 = scmp.lt.s32.totalorder %s3141_s4, %s3141_s4 }
  0x16   :  { %p3148_p3 = por %p3147_p2, %p3146_p1 }
  0x18   :  { %p3149_p4 = pnand %p3148_p3, %p3142_p0 }
  0x1a   :  { %3152 = shalt.err (!%p3149_p4)
}
  0x1b   :  { %s3475_s0 = smov 128   ;;  %s3476_s23 = smov 8  }
  0x1c   :  { %s4207_s24 = sld [smem:[#allocation41_spill]]  ;;  %s3161_s6 = scalar_lea.vmem %s84_s30, 512 }
  0x1d   :  { %p3162_p5 = scmp.ne.s32.totalorder %s84_s30, %s3161_s6  ;;  %p3166_p6 = scmp.lt.s32.totalorder %s84_s30, %s84_s30 }
  0x1e   :  { %p3167_p7 = scmp.lt.s32.totalorder %s3161_s6, %s3161_s6 }
  0x20   :  { %p3168_p8 = por %p3167_p7, %p3166_p6 }
  0x22   :  { %65 = dma.hbm_to_vmem [thread:$0]  %s4207_s24, 1024, %s60_s28, [#allocation6], %s3475_s0, %s3475_s0, %s3476_s23  }
  0x23   :  { %p3169_p9 = pnand %p3168_p8, %p3162_p5 }
  0x25   :  { %3172 = shalt.err (!%p3169_p9)
}
  0x26   :  { %s4208_s2 = sld [smem:[#allocation43_spill]]  ;;  %s3477_s27 = smov [#allocation11]  }
  0x27   :  { %s106_s3 = sshll.u32 %s3477_s27, 4  ;;  %s3478_s29 = smov [#allocation14]   ;;  %s107_s3 = int_to_ptr.vmem [resolvable:$true] %s106_s3 }
  0x28   :  { %s129_s4 = sshll.u32 %s3478_s29, 4  ;;  %s3181_s28 = scalar_lea.vmem %s107_s3, 16  ;;  %s130_s4 = int_to_ptr.vmem [resolvable:$true] %s129_s4 }
  0x29   :  { %p3182_p10 = scmp.ne.s32.totalorder %s107_s3, %s3181_s28  ;;  %s3185_s1 = scalar_lea.vmem %s107_s3, 32 }
  0x2a   :  { %p3186_p11 = scmp.lt.s32.totalorder %s107_s3, %s107_s3  ;;  %p3187_p12 = scmp.lt.s32.totalorder %s3185_s1, %s3181_s28 }
  0x2c   :  { %89 = dma.hbm_to_vmem [thread:$0]  %s4208_s2, 512, %s84_s30, [#allocation9], %s3475_s0, %s3475_s0, %s3476_s23  }
  0x2d   :  { %p3188_p13 = por %p3187_p12, %p3186_p11 }
  0x2f   :  { %p3189_p0 = pnand %p3188_p13, %p3182_p10 }
  0x31   :  { %3192 = shalt.err (!%p3189_p0)
}
  0x32   :  { %109 = dma.hbm_to_vmem [thread:$0]  %s4183_s7, 16, %s107_s3, [#allocation12]  }
  0x33   :  { %s3201_s6 = scalar_lea.vmem %s130_s4, 1536  ;;  %p3206_p2 = scmp.lt.s32.totalorder %s130_s4, %s130_s4 }
  0x34   :  { %p3202_p1 = scmp.ne.s32.totalorder %s130_s4, %s3201_s6  ;;  %p3207_p3 = scmp.lt.s32.totalorder %s3201_s6, %s3201_s6 }
  0x36   :  { %p3208_p4 = por %p3207_p3, %p3206_p2 }
  0x38   :  { %p3209_p5 = pnand %p3208_p4, %p3202_p1 }
  0x3a   :  { %3212 = shalt.err (!%p3209_p5)
}
  0x3b   :  { %135 = dma.hbm_to_vmem [thread:$0]  %s4186_s10, 1536, %s130_s4, [#allocation15], %s3475_s0, %s3475_s0, %s3476_s23  }
  0x3c   :  { %s3479_s26 = smov [#allocation17]   ;;  %s3480_s27 = smov [#allocation20]  }
  0x3d   :  { %s153_s2 = sshll.u32 %s3479_s26, 4  ;;  %s177_s29 = sshll.u32 %s3480_s27, 4  ;;  %s154_s2 = int_to_ptr.vmem [resolvable:$true] %s153_s2  ;;  %s178_s29 = int_to_ptr.vmem [resolvable:$true] %s177_s29 }
  0x3e   :  { %s3221_s7 = scalar_lea.vmem %s154_s2, 48  ;;  %s3225_s3 = scalar_lea.vmem %s154_s2, 64 }
  0x3f   :  { %p3222_p6 = scmp.ne.s32.totalorder %s154_s2, %s3221_s7  ;;  %p3226_p7 = scmp.lt.s32.totalorder %s154_s2, %s154_s2 }
  0x40   :  { %p3227_p8 = scmp.lt.s32.totalorder %s3225_s3, %s3221_s7 }
  0x42   :  { %p3228_p9 = por %p3227_p8, %p3226_p7 }
  0x44   :  { %p3229_p10 = pnand %p3228_p9, %p3222_p6 }
  0x46   :  { %3232 = shalt.err (!%p3229_p10)
}
  0x47   :  { %s3481_s28 = smov 16   ;;  %s3482_s1 = smov 1  }
  0x48   :  { %159 = dma.hbm_to_vmem [thread:$0]  %s4188_s12, 48, %s154_s2, [#allocation18], %s3481_s28, %s3481_s28, %s3482_s1  }
  0x49   :  { %s3241_s5 = scalar_lea.vmem %s178_s29, 1536  ;;  %p3246_p12 = scmp.lt.s32.totalorder %s178_s29, %s178_s29 }
  0x4a   :  { %p3242_p11 = scmp.ne.s32.totalorder %s178_s29, %s3241_s5  ;;  %p3247_p13 = scmp.lt.s32.totalorder %s3241_s5, %s3241_s5 }
  0x4c   :  { %p3248_p0 = por %p3247_p13, %p3246_p12 }
  0x4e   :  { %p3249_p1 = pnand %p3248_p0, %p3242_p11 }
  0x50   :  { %3252 = shalt.err (!%p3249_p1)
}
  0x51   :  { %183 = dma.hbm_to_vmem [thread:$0]  %s4190_s14, 1536, %s178_s29, [#allocation21], %s3475_s0, %s3475_s0, %s3476_s23  }
  0x52   :  { %s3483_s30 = smov [#allocation2]   ;;  %s3484_s26 = smov [#allocation7]  }
  0x53   :  { %s47_s25 = sshll.u32 %s3483_s30, 4  ;;  %s71_s27 = sshll.u32 %s3484_s26, 4  ;;  %s48_s25 = int_to_ptr.vmem [resolvable:$true] %s47_s25  ;;  %s72_s27 = int_to_ptr.vmem [resolvable:$true] %s71_s27 }
  0x54   :  { %s3261_s12 = scalar_lea.vmem %s48_s25, 256  ;;  %p3266_p3 = scmp.lt.s32.totalorder %s48_s25, %s48_s25 }
  0x55   :  { %p3262_p2 = scmp.ne.s32.totalorder %s48_s25, %s3261_s12  ;;  %p3267_p4 = scmp.lt.s32.totalorder %s3261_s12, %s3261_s12 }
  0x57   :  { %p3268_p5 = por %p3267_p4, %p3266_p3 }
  0x59   :  { %p3269_p6 = pnand %p3268_p5, %p3262_p2 }
  0x5b   :  { %3272 = shalt.err (!%p3269_p6)
}
  0x5c   :  { %s4209_s3 = sld [smem:[#allocation40_spill]]  ;;  %s3281_s14 = scalar_lea.vmem %s72_s27, 512 }
  0x5d   :  { %p3282_p7 = scmp.ne.s32.totalorder %s72_s27, %s3281_s14  ;;  %p3286_p8 = scmp.lt.s32.totalorder %s72_s27, %s72_s27 }
  0x5e   :  { %p3287_p9 = scmp.lt.s32.totalorder %s3281_s14, %s3281_s14 }
  0x60   :  { %p3288_p10 = por %p3287_p9, %p3286_p8 }
  0x62   :  { %53 = dma.hbm_to_vmem [thread:$0]  %s4209_s3, 256, %s48_s25, [#allocation3], %s3475_s0, %s3475_s0, %s3476_s23  }
  0x63   :  { %p3289_p11 = pnand %p3288_p10, %p3282_p7 }
  0x65   :  { %3292 = shalt.err (!%p3289_p11)
}
  0x66   :  { %s4210_s4 = sld [smem:[#allocation42_spill]]  ;;  %s3485_s5 = smov [#allocation10]  }
  0x67   :  { %s96_s24 = sshll.u32 %s3485_s5, 4  ;;  %s3486_s6 = smov [#allocation13]   ;;  %s97_s24 = int_to_ptr.vmem [resolvable:$true] %s96_s24 }
  0x68   :  { %s115_s30 = sshll.u32 %s3486_s6, 4  ;;  %s3301_s25 = scalar_lea.vmem %s97_s24, 16  ;;  %s116_s30 = int_to_ptr.vmem [resolvable:$true] %s115_s30 }
  0x69   :  { %p3302_p12 = scmp.ne.s32.totalorder %s97_s24, %s3301_s25  ;;  %s3305_s26 = scalar_lea.vmem %s97_s24, 32 }
  0x6a   :  { %p3306_p13 = scmp.lt.s32.totalorder %s97_s24, %s97_s24  ;;  %p3307_p0 = scmp.lt.s32.totalorder %s3305_s26, %s3301_s25 }
  0x6c   :  { %77 = dma.hbm_to_vmem [thread:$0]  %s4210_s4, 512, %s72_s27, [#allocation6], %s3475_s0, %s3475_s0, %s3476_s23  }
  0x6d   :  { %p3308_p1 = por %p3307_p0, %p3306_p13 }
  0x6f   :  { %p3309_p2 = pnand %p3308_p1, %p3302_p12 }
  0x71   :  { %3312 = shalt.err (!%p3309_p2)
}
  0x72   :  { %s4211_s7 = sld [smem:[#allocation44_spill]]  ;;  %s3321_s3 = scalar_lea.vmem %s116_s30, 768 }
  0x73   :  { %p3322_p3 = scmp.ne.s32.totalorder %s116_s30, %s3321_s3  ;;  %p3326_p4 = scmp.lt.s32.totalorder %s116_s30, %s116_s30 }
  0x74   :  { %p3327_p5 = scmp.lt.s32.totalorder %s3321_s3, %s3321_s3 }
  0x76   :  { %p3328_p6 = por %p3327_p5, %p3326_p4 }
  0x78   :  { %99 = dma.hbm_to_vmem [thread:$0]  %s4211_s7, 16, %s97_s24, [#allocation9]  }
  0x79   :  { %p3329_p7 = pnand %p3328_p6, %p3322_p3 }
  0x7b   :  { %3332 = shalt.err (!%p3329_p7)
}
  0x7c   :  { %121 = dma.hbm_to_vmem [thread:$0]  %s4184_s8, 768, %s116_s30, [#allocation12], %s3475_s0, %s3475_s0, %s3476_s23  }
  0x7d   :  { %s3487_s29 = smov [#allocation16]   ;;  %s3488_s4 = smov [#allocation19]  }
  0x7e   :  { %s141_s10 = sshll.u32 %s3487_s29, 4  ;;  %s165_s5 = sshll.u32 %s3488_s4, 4  ;;  %s142_s10 = int_to_ptr.vmem [resolvable:$true] %s141_s10  ;;  %s166_s5 = int_to_ptr.vmem [resolvable:$true] %s165_s5 }
  0x7f   :  { %s3341_s24 = scalar_lea.vmem %s142_s10, 48  ;;  %s3345_s6 = scalar_lea.vmem %s142_s10, 64 }
  0x80   :  { %p3342_p8 = scmp.ne.s32.totalorder %s142_s10, %s3341_s24  ;;  %p3346_p9 = scmp.lt.s32.totalorder %s142_s10, %s142_s10 }
  0x81   :  { %p3347_p10 = scmp.lt.s32.totalorder %s3345_s6, %s3341_s24 }
  0x83   :  { %p3348_p11 = por %p3347_p10, %p3346_p9 }
  0x85   :  { %p3349_p12 = pnand %p3348_p11, %p3342_p8 }
  0x87   :  { %3352 = shalt.err (!%p3349_p12)
}
  0x88   :  { %147 = dma.hbm_to_vmem [thread:$0]  %s4187_s11, 48, %s142_s10, [#allocation15], %s3481_s28, %s3481_s28, %s3482_s1  }
  0x89   :  { %s3361_s8 = scalar_lea.vmem %s166_s5, 1536  ;;  %p3366_p0 = scmp.lt.s32.totalorder %s166_s5, %s166_s5 }
  0x8a   :  { %p3362_p13 = scmp.ne.s32.totalorder %s166_s5, %s3361_s8  ;;  %p3367_p1 = scmp.lt.s32.totalorder %s3361_s8, %s3361_s8 }
  0x8c   :  { %p3368_p2 = por %p3367_p1, %p3366_p0 }
  0x8e   :  { %p3369_p3 = pnand %p3368_p2, %p3362_p13 }
  0x90   :  { %3372 = shalt.err (!%p3369_p3)
}
  0x91   :  { %171 = dma.hbm_to_vmem [thread:$0]  %s4189_s13, 1536, %s166_s5, [#allocation18], %s3475_s0, %s3475_s0, %s3476_s23  }
  0x92   :  { %s3489_s2 = smov [#allocation22]   ;;  %s3490_s3 = smov [#allocation23]  }
  0x93   :  { %s193_s7 = sshll.u32 %s3489_s2, 4  ;;  %s205_s27 = sshll.u32 %s3490_s3, 4  ;;  %s194_s7 = int_to_ptr.vmem [resolvable:$true] %s193_s7  ;;  %s206_s27 = int_to_ptr.vmem [resolvable:$true] %s205_s27 }
  0x94   :  { %s3381_s11 = scalar_lea.vmem %s194_s7, 512  ;;  %p3386_p5 = scmp.lt.s32.totalorder %s194_s7, %s194_s7 }
  0x95   :  { %p3382_p4 = scmp.ne.s32.totalorder %s194_s7, %s3381_s11  ;;  %p3387_p6 = scmp.lt.s32.totalorder %s3381_s11, %s3381_s11 }
  0x97   :  { %p3388_p7 = por %p3387_p6, %p3386_p5 }
  0x99   :  { %p3389_p8 = pnand %p3388_p7, %p3382_p4 }
  0x9b   :  { %3392 = shalt.err (!%p3389_p8)
}
  0x9c   :  { %199 = dma.hbm_to_vmem [thread:$0]  %s4193_s17, 512, %s194_s7, [#allocation21], %s3475_s0, %s3475_s0, %s3476_s23  }
  0x9d   :  { %s3401_s13 = scalar_lea.vmem %s206_s27, 512  ;;  %p3406_p10 = scmp.lt.s32.totalorder %s206_s27, %s206_s27 }
  0x9e   :  { %p3402_p9 = scmp.ne.s32.totalorder %s206_s27, %s3401_s13  ;;  %p3407_p11 = scmp.lt.s32.totalorder %s3401_s13, %s3401_s13 }
  0xa0   :  { %p3408_p12 = por %p3407_p11, %p3406_p10 }
  0xa2   :  { %p3409_p13 = pnand %p3408_p12, %p3402_p9 }
  0xa4   :  { %3412 = shalt.err (!%p3409_p13)
}
  0xa5   :  { %211 = dma.hbm_to_vmem [thread:$0]  %s4194_s18, 512, %s206_s27, [#allocation24], %s3475_s0, %s3475_s0, %s3476_s23  }
  0xa6   :  { %3453 = dma.done.wait [#allocation3], 256  }
  0xa7   :  { %3454 = vsyncadd [#allocation3], 4294967040 }
  0xa8   :  { %3455 = dma.done.wait [#allocation6], 1536  }
  0xa9   :  { %3456 = vsyncadd [#allocation6], 4294965760 }
  0xaa   :  { %3457 = dma.done.wait [#allocation9], 528  }
  0xab   :  { %3458 = vsyncadd [#allocation9], 4294966768 }
  0xac   :  { %3459 = dma.done.wait [#allocation12], 784  }
  0xad   :  { %3460 = vsyncadd [#allocation12], 4294966512 }
  0xae   :  { %3461 = dma.done.wait [#allocation15], 1584  }
  0xaf   :  { %3462 = vsyncadd [#allocation15], 4294965712 }
  0xb0   :  { %3463 = dma.done.wait [#allocation18], 1584  }
  0xb1   :  { %3464 = vsyncadd [#allocation18], 4294965712 }
  0xb2   :  { %3465 = dma.done.wait [#allocation21], 2048  }
  0xb3   :  { %3466 = vsyncadd [#allocation21], 4294965248 }
  0xb4   :  { %3467 = dma.done.wait [#allocation24], 512  }
  0xb5   :  { %3468 = vsyncadd [#allocation24], 4294966784  ;;  %v3491_v0 = vmov 0.0   ;;  %vm3492_vm0 = vmmov 0   ;;  %v362_v1 = vld [vmem:[#allocation7 + $0x18] sm:$0xff]  ;;  %v361_v2 = vld [vmem:[#allocation7 + $0x10] sm:$0xff]  ;;  %v267_v18 = vlaneseq }
  0xb6   :  { %2826 = vmatprep.subr.mxu1 %v3491_v0  ;;  %2834 = vmatprep.mubr.msk.f32.mxu1 %vm3492_vm0, %v3491_v0  ;;  %v360_v3 = vld [vmem:[#allocation7 + $0x8] sm:$0xff]  ;;  %v359_v4 = vld [vmem:[#allocation7] sm:$0xff]  ;;  %v358_v5 = vld [vmem:[#allocation2 + $0x8] sm:$0xff]  ;;  %vm370_vm1 = vcmask 261120   ;;  %v3493_v19 = vmov 1966171168  }
  0xb7   :  { %2807 = vmatprep.subr.mxu0 %v3491_v0  ;;  %2823 = vmatprep.mubr.msk.f32.mxu0 %vm3492_vm0, %v3491_v0  ;;  %v447_v6 = vld [vmem:[#allocation8 + $0x18] sm:$0xff]  ;;  %v3699_v7 = vld [vmem:[#allocation5] sm:$0xff]  ;;  %v446_v8 = vld [vmem:[#allocation8 + $0x10] sm:$0xff]  ;;  %v580_v20 = vunpack.c.l.s4 %v3493_v19  ;;  %v3736_v22 = vshrl.u32 %v267_v18, 7  ;;  %vm762_vm2 = vcmask 1041409   ;;  %vm764_vm3 = vcmask 1042434  }
  0xb8   :  { %2827 = vmatpush3.msra.mxu1 %v362_v1  ;;  %v445_v9 = vld [vmem:[#allocation8 + $0x8] sm:$0xff]  ;;  %v444_v10 = vld [vmem:[#allocation8] sm:$0xff]  ;;  %v3706_v12 = vld [vmem:[#allocation5 + $0x10] sm:$0xff]  ;;  %vm766_vm4 = vcmask 1043459   ;;  %vm768_vm5 = vcmask 1044484   ;;  %vm770_vm6 = vcmask 1045509  }
  0xb9   :  { %2828 = vmatprep.subr.mxu1 %v3491_v0  ;;  %v3704_v11 = vld [vmem:[#allocation5 + $0x8] sm:$0xff]  ;;  %v3713_v13 = vld [vmem:[#allocation5 + $0x18] sm:$0xff]  ;;  %v3715_v14 = vld [vmem:[#allocation5 + $0x20] sm:$0xff]  ;;  %v581_v21 = vunpack.c.0.s8 %v580_v20  ;;  %v3740_v32 = vsub.s32 0, %v3736_v22  ;;  %vm772_vm7 = vcmask 1046534   ;;  %vm774_vm8 = vcmask 1047559  }
  0xba   :  { %2829 = vmatpush3.msra.mxu1 %v361_v2  ;;  %v3721_v15 = vld [vmem:[#allocation5 + $0x28] sm:$0xff]  ;;  %v3723_v16 = vld [vmem:[#allocation5 + $0x30] sm:$0xff]  ;;  %v3729_v17 = vld [vmem:[#allocation5 + $0x38] sm:$0xff]  ;;  %vm777_vm9 = vcmask 64512   ;;  %s4212_s10 = sld [smem:[#allocation38_spill]]  ;;  %vm283_vm10 = vcmask 523264  }
  0xbb   :  { %2830 = vmatprep.subr.mxu1 %v3491_v0  ;;  %v2641_v23 = vld [vmem:[#allocation10] ss:$0 sm:$0xff]  ;;  %v584_v24 = vsub.s32 %v581_v21, %v3736_v22  ;;  %s4213_s24 = sld [smem:[#allocation39_spill]]  ;;  %vm1176_vm12 = vcmask 130048  }
  0xbc   :  { %2831 = vmatpush3.msra.mxu1 %v360_v3  ;;  %v2651_v3 = vld [vmem:[#allocation11] ss:$0 sm:$0xff] }
  0xbd   :  { %2832 = vmatprep.subr.mxu1 %v3491_v0 }
  0xbe   :  { %2833 = vmatpush3.msra.mxu1 %v359_v4 }
  0xbf   :  { %2835 = vmatmul.mubr.msk.f32.vlgmr.msra.gmra.mxu1 %vm370_vm1, %v358_v5  ;;  %2837 = vmatprep.subr.mxu1 %v447_v6 }
  0xc0   :  { %2838 = vmatpush3.msra.mxu1 %v447_v6  ;;  %2845 = vmatprep.mubr.msk.f32.mxu1 %vm370_vm1, %v3699_v7 }
  0xc1   :  { %2839 = vmatprep.subr.mxu1 %v446_v8 }
  0xc2   :  { %2840 = vmatpush3.msra.mxu1 %v446_v8 }
  0xc3   :  { %2841 = vmatprep.subr.mxu1 %v445_v9 }
  0xc4   :  { %2842 = vmatpush3.msra.mxu1 %v445_v9 }
  0xc5   :  { %2843 = vmatprep.subr.mxu1 %v444_v10 }
  0xc6   :  { %2844 = vmatpush3.msra.mxu1 %v444_v10 }
  0xc7   :  { %2846 = vmatmul.mubr.msk.f32.vlgmr.msra.gmra.mxu1 %vm370_vm1, %v3704_v11  ;;  %2875 = vmatprep.subr.mxu1 %v3491_v0 }
  0xc8   :  { %2848 = vmatprep.mubr.msk.f32.mxu1 %vm370_vm1, %v3706_v12 }
  0xcb   :  { %2849 = vmatmul.mubr.msk.f32.gmra.mxu1 %vm370_vm1, %v3713_v13 }
  0xcc   :  { %2851 = vmatprep.mubr.msk.f32.mxu1 %vm370_vm1, %v3715_v14 }
  0xcf   :  { %2852 = vmatmul.mubr.msk.f32.gmra.mxu1 %vm370_vm1, %v3721_v15 }
  0xd0   :  { %2854 = vmatprep.mubr.msk.f32.mxu1 %vm370_vm1, %v3723_v16 }
  0xd3   :  { %2855 = vmatmul.mubr.msk.f32.gmra.mxu1 %vm370_vm1, %v3729_v17 }
  0xd4   :  { %2883 = vmatprep.mubr.msk.f32.mxu1 %vm3492_vm0, %v3491_v0 }
 0x17f   :  { %v440_v25 = vpop.f32.mrf.mxu1 }
 0x180   :  { %v441_v26 = vadd.f32 %v2641_v23, %v440_v25 }
 0x181   :  { %v2836_v27 = vpop.f32.mrf.mxu1 }
 0x182   :  { %v578_v28 = vcombine.high %v441_v26, %v441_v26  ;;  %v585_v29 = vrot.slane %v441_v26, %v584_v24 }
 0x184   :  { %v592_v30 = vrot.slane %v578_v28, %v584_v24  ;;  %v593_v31 = vcombine.high %v585_v29, %v585_v29  ;;  %v601_v33 = vrot.slane %v585_v29, %v584_v24 }
 0x186   :  { %v615_v34 = vrot.slane %v593_v31, %v584_v24  ;;  %v594_v35 = vcombine.high %v592_v30, %v592_v30  ;;  %v630_v38 = vrot.slane %v601_v33, %v3740_v32  ;;  %v623_v40 = vcombine.high %v601_v33, %v601_v33 }
 0x187   :  { %v2847_v36 = vpop.f32.mrf.mxu1  ;;  %v608_v49 = vrot.slane %v592_v30, %v584_v24 }
 0x188   :  { %v634_v37 = vrot.slane %v615_v34, %v3740_v32  ;;  %v625_v39 = vcombine.high %v615_v34, %v615_v34  ;;  %v622_v45 = vrot.slane %v594_v35, %v584_v24  ;;  %v638_v48 = vrot.slane %v623_v40, %v3740_v32 }
 0x189   :  { %v538_v41 = vpop.f32.mrf.mxu1  ;;  %v646_v56 = vrot.slane %v608_v49, %v3740_v32  ;;  %v624_v57 = vcombine.high %v608_v49, %v608_v49 }
 0x18a   :  { %v668_v42 = vadd.f32 %v2847_v36, %v634_v37  ;;  %v667_v43 = vadd.f32 %v630_v38, %v538_v41  ;;  %v642_v44 = vrot.slane %v625_v39, %v3740_v32  ;;  %v650_v52 = vrot.slane %v622_v45, %v3740_v32 }
 0x18b   :  { %v2850_v46 = vpop.f32.mrf.mxu1  ;;  %v626_v53 = vcombine.high %v622_v45, %v622_v45  ;;  %v654_v63 = vrot.slane %v624_v57, %v3740_v32  ;;  %v3759_v39 = vand.u32 127, %v267_v18 }
 0x18c   :  { %3065 = vtanh.f32 %v668_v42  ;;  %v670_v47 = vadd.f32 %v2850_v46, %v642_v44 }
 0x18d   :  { %3067 = vtanh.f32 %v667_v43  ;;  %v548_v50 = vpop.f32.mrf.mxu1  ;;  %v658_v60 = vrot.slane %v626_v53, %v3740_v32  ;;  %v3765_v41 = vsub.s32 %v3759_v39, %v3736_v22 }
 0x18e   :  { %3069 = vtanh.f32 %v670_v47  ;;  %v669_v51 = vadd.f32 %v638_v48, %v548_v50 }
 0x18f   :  { %v2853_v54 = vpop.f32.mrf.mxu1 }
 0x190   :  { %3071 = vtanh.f32 %v669_v51  ;;  %v672_v55 = vadd.f32 %v2853_v54, %v650_v52 }
 0x191   :  { %v558_v58 = vpop.f32.mrf.mxu1 }
 0x192   :  { %3073 = vtanh.f32 %v672_v55  ;;  %v671_v59 = vadd.f32 %v646_v56, %v558_v58 }
 0x193   :  { %v2856_v61 = vpop.f32.mrf.mxu1 }
 0x194   :  { %3075 = vtanh.f32 %v671_v59  ;;  %v674_v62 = vadd.f32 %v2856_v61, %v658_v60 }
 0x195   :  { %v568_v1 = vpop.f32.mrf.mxu1 }
 0x196   :  { %3077 = vtanh.f32 %v674_v62  ;;  %v673_v2 = vadd.f32 %v654_v63, %v568_v1  ;;  %v266_v1 = vld [vmem:[%s4212_s10] sm:$0xff] }
 0x198   :  { %3079 = vtanh.f32 %v673_v2  ;;  %v3494_v2 = vmov 0  }
 0x199   :  { %v3066_v4 = vpop.eup %3065  ;;  %3063 = vset.pattern.permute.xlu1 %v3494_v2  ;;  %3064 = vset.pattern.permute.xlu0 %v3494_v2 }
 0x19a   :  { %v3068_v5 = vpop.eup %3067  ;;  %v691_v20 = vmul.f32 %v3066_v4, %v2651_v3  ;;  %v281_v4 = vld [vmem:[%s4213_s24 + $0x30] sm:$0xff] }
 0x19b   :  { %v3070_v6 = vpop.eup %3069  ;;  %v690_v8 = vmul.f32 %v3068_v5, %v2651_v3  ;;  %v280_v5 = vld [vmem:[%s4213_s24 + $0x28] sm:$0xff] }
 0x19c   :  { %v693_v9 = vmul.f32 %v3070_v6, %v2651_v3  ;;  %v701_v26 = vsel %vm370_vm1, %v691_v20, 0.0  ;;  %v279_v6 = vld [vmem:[%s4213_s24 + $0x20] sm:$0xff]  ;;  %v788_v20 = vsub.s32 1, %v3736_v22 }
 0x19d   :  { %v3072_v10 = vpop.eup %3071  ;;  %v698_v19 = vsel %vm370_vm1, %v690_v8, 0.0  ;;  %v278_v8 = vld [vmem:[%s4213_s24 + $0x18] sm:$0xff] }
 0x19e   :  { %699 = vadd.xlane.f32.xlu0 %v698_v19  ;;  %v707_v21 = vsel %vm370_vm1, %v693_v9, 0.0  ;;  %v692_v23 = vmul.f32 %v3072_v10, %v2651_v3  ;;  %v277_v9 = vld [vmem:[%s4213_s24 + $0x10] sm:$0xff]  ;;  %v276_v10 = vld [vmem:[%s4213_s24 + $0x8] sm:$0xff]  ;;  %v275_v19 = vld [vmem:[%s4213_s24] sm:$0xff] }
 0x19f   :  { %v3074_v24 = vpop.eup %3073  ;;  %708 = vadd.xlane.f32.xlu1 %v707_v21  ;;  %v792_v21 = vsub.s32 2, %v3736_v22 }
 0x1a0   :  { %v704_v27 = vsel %vm370_vm1, %v692_v23, 0.0  ;;  %v695_v29 = vmul.f32 %v3074_v24, %v2651_v3  ;;  %v796_v23 = vsub.s32 3, %v3736_v22 }
 0x1a1   :  { %v3076_v25 = vpop.eup %3075 }
 0x1a2   :  { %702 = vadd.xlane.f32.xlu0 %v701_v26  ;;  %v694_v28 = vmul.f32 %v3076_v25, %v2651_v3  ;;  %v713_v34 = vsel %vm370_vm1, %v695_v29, 0.0 }
 0x1a3   :  { %v3078_v30 = vpop.eup %3077  ;;  %705 = vadd.xlane.f32.xlu1 %v704_v27 }
 0x1a4   :  { %v710_v31 = vsel %vm370_vm1, %v694_v28, 0.0  ;;  %v697_v36 = vmul.f32 %v3078_v30, %v2651_v3  ;;  %v800_v30 = vsub.s32 4, %v3736_v22 }
 0x1a5   :  { %v3080_v33 = vpop.eup %3079 }
 0x1a6   :  { %711 = vadd.xlane.f32.xlu0 %v710_v31  ;;  %v696_v35 = vmul.f32 %v3080_v33, %v2651_v3  ;;  %v719_v38 = vsel %vm370_vm1, %v697_v36, 0.0  ;;  %v282_v3 = vld [vmem:[%s4213_s24 + $0x38] sm:$0xff]  ;;  %v804_v36 = vsub.s32 5, %v3736_v22 }
 0x1a7   :  { %714 = vadd.xlane.f32.xlu1 %v713_v34  ;;  %2808 = vmatpush3.msra.mxu0 %v282_v3 }
 0x1a8   :  { %v716_v37 = vsel %vm370_vm1, %v696_v35, 0.0  ;;  %2809 = vmatprep.subr.mxu0 %v3491_v0 }
 0x1a9   :  { %2810 = vmatpush3.msra.mxu0 %v281_v4 }
 0x1aa   :  { %717 = vadd.xlane.f32.xlu0 %v716_v37  ;;  %2811 = vmatprep.subr.mxu0 %v3491_v0 }
 0x1ab   :  { %720 = vadd.xlane.f32.xlu1 %v719_v38  ;;  %2812 = vmatpush3.msra.mxu0 %v280_v5 }
 0x1ac   :  { %2813 = vmatprep.subr.mxu0 %v3491_v0 }
 0x1ad   :  { %2814 = vmatpush3.msra.mxu0 %v279_v6 }
 0x1ae   :  { %2815 = vmatprep.subr.mxu0 %v3491_v0 }
 0x1af   :  { %2816 = vmatpush3.msra.mxu0 %v278_v8 }
 0x1b0   :  { %2817 = vmatprep.subr.mxu0 %v3491_v0 }
 0x1b1   :  { %2818 = vmatpush3.msra.mxu0 %v277_v9 }
 0x1b2   :  { %2819 = vmatprep.subr.mxu0 %v3491_v0 }
 0x1b3   :  { %2820 = vmatpush3.msra.mxu0 %v276_v10 }
 0x1b4   :  { %2821 = vmatprep.subr.mxu0 %v3491_v0 }
 0x1b5   :  { %2822 = vmatpush3.msra.mxu0 %v275_v19 }
 0x1b6   :  { %2857 = vmatprep.subr.mxu0 %v3491_v0 }
 0x1bc   :  { %270 = vperm.xlu1 %3063, %v266_v1  }
 0x227   :  { %v3761_v40 = vpop.xlane.xlu0 %699 }
 0x228   :  { %v3767_v42 = vpop.xlane.xlu1 %708  ;;  %v733_v44 = vrot.slane %v3761_v40, %v3765_v41 }
 0x229   :  { %v745_v47 = vrot.slane %v3767_v42, %v3765_v41 }
 0x22b   :  { %v3769_v43 = vpop.xlane.xlu0 %702 }
 0x22c   :  { %v737_v45 = vrot.slane %v3769_v43, %v3765_v41  ;;  %v3775_v18 = vpop.xlane.xlu1 %705 }
 0x22d   :  { %v741_v46 = vrot.slane %v3775_v18, %v3765_v41 }
 0x22e   :  { %v763_v48 = vsel %vm762_vm2, %v737_v45, %v733_v44 }
 0x22f   :  { %v765_v49 = vsel %vm764_vm3, %v741_v46, %v763_v48  ;;  %v3783_v50 = vpop.xlane.xlu0 %711 }
 0x230   :  { %v767_v51 = vsel %vm766_vm4, %v745_v47, %v765_v49  ;;  %v749_v52 = vrot.slane %v3783_v50, %v3765_v41  ;;  %v3788_v53 = vpop.xlane.xlu1 %714 }
 0x231   :  { %v753_v54 = vrot.slane %v3788_v53, %v3765_v41 }
 0x232   :  { %v769_v55 = vsel %vm768_vm5, %v749_v52, %v767_v51 }
 0x233   :  { %v3793_v56 = vpop.xlane.xlu0 %717  ;;  %v771_v57 = vsel %vm770_vm6, %v753_v54, %v769_v55 }
 0x234   :  { %v757_v58 = vrot.slane %v3793_v56, %v3765_v41  ;;  %v3798_v59 = vpop.xlane.xlu1 %720 }
 0x235   :  { %v761_v60 = vrot.slane %v3798_v59, %v3765_v41 }
 0x236   :  { %v773_v61 = vsel %vm772_vm7, %v757_v58, %v771_v57 }
 0x237   :  { %v775_v62 = vsel %vm774_vm8, %v761_v60, %v773_v61 }
 0x238   :  { %v778_v63 = vsel %vm777_vm9, %v775_v62, -inf  ;;  %v271_v45 = vpop.permute.xlu1 %270 }
 0x239   :  { %779 = vmax.xlane.f32.xlu0 %v778_v63  ;;  %vm272_vm11 = vcmp.eq.s32.totalorder %v3759_v39, %v271_v45  ;;  %v1261_v45 = vld [vmem:[#allocation14 + $0x18] sm:$0xff] }
 0x23a   :  { %v2639_v47 = vsel %vm272_vm11, 1.0, %v3491_v0  ;;  %2876 = vmatpush3.msra.mxu1 %v1261_v45 }
 0x23b   :  { %2824 = vmatmul.mubr.msk.f32.vlgmr.msra.gmra.mxu0 %vm283_vm10, %v2639_v47  ;;  %2877 = vmatprep.subr.mxu1 %v3491_v0  ;;  %v1258_v47 = vld [vmem:[#allocation14] sm:$0xff] }
 0x23c   :  { %2865 = vmatprep.mubr.msk.f32.mxu0 %vm3492_vm0, %v3491_v0 }
 0x2c2   :  { %v780_v24 = vpop.xlane.xlu0 %779 }
 0x2c3   :  { %v785_v25 = vrot.slane %v780_v24, %v3740_v32  ;;  %v789_v26 = vrot.slane %v780_v24, %v788_v20  ;;  %v793_v27 = vrot.slane %v780_v24, %v792_v21  ;;  %v797_v31 = vrot.slane %v780_v24, %v796_v23 }
 0x2c4   :  { %v801_v37 = vrot.slane %v780_v24, %v800_v30  ;;  %v805_v44 = vrot.slane %v780_v24, %v804_v36 }
 0x2c5   :  { %v822_v28 = vsub.f32 %v3761_v40, %v785_v25  ;;  %v823_v29 = vsub.f32 %v3769_v43, %v789_v26  ;;  %v824_v33 = vsub.f32 %v3775_v18, %v793_v27  ;;  %v825_v38 = vsub.f32 %v3767_v42, %v797_v31 }
 0x2c6   :  { %v808_v43 = vsub.s32 6, %v3736_v22  ;;  %v826_v18 = vsub.f32 %v3783_v50, %v801_v37  ;;  %v812_v42 = vsub.s32 7, %v3736_v22  ;;  %v827_v49 = vsub.f32 %v3788_v53, %v805_v44 }
 0x2c7   :  { %v830_v34 = vmul.f32 1.442695, %v822_v28  ;;  %v832_v35 = vmul.f32 1.442695, %v823_v29  ;;  %v834_v40 = vmul.f32 1.442695, %v824_v33 }
 0x2c8   :  { %v836_v46 = vmul.f32 1.442695, %v825_v38  ;;  %v809_v48 = vrot.slane %v780_v24, %v808_v43  ;;  %v838_v51 = vmul.f32 1.442695, %v826_v18  ;;  %v813_v39 = vrot.slane %v780_v24, %v812_v42  ;;  %v1260_v18 = vld [vmem:[#allocation14 + $0x10] sm:$0xff] }
 0x2c9   :  { %3081 = vpow2.f32 %v830_v34  ;;  %v840_v54 = vmul.f32 1.442695, %v827_v49  ;;  %2878 = vmatpush3.msra.mxu1 %v1260_v18  ;;  %v1350_v49 = vld [vmem:[#allocation13 + $0x10] sm:$0xff] }
 0x2ca   :  { %3083 = vpow2.f32 %v832_v35  ;;  %v828_v52 = vsub.f32 %v3793_v56, %v809_v48  ;;  %v829_v57 = vsub.f32 %v3798_v59, %v813_v39  ;;  %2879 = vmatprep.subr.mxu1 %v3491_v0  ;;  %v1351_v48 = vld [vmem:[#allocation13 + $0x18] sm:$0xff] }
 0x2cb   :  { %3085 = vpow2.f32 %v834_v40 }
 0x2cc   :  { %3087 = vpow2.f32 %v836_v46  ;;  %v842_v53 = vmul.f32 1.442695, %v828_v52  ;;  %v844_v60 = vmul.f32 1.442695, %v829_v57  ;;  %v1259_v46 = vld [vmem:[#allocation14 + $0x8] sm:$0xff] }
 0x2cd   :  { %3089 = vpow2.f32 %v838_v51  ;;  %2880 = vmatpush3.msra.mxu1 %v1259_v46 }
 0x2ce   :  { %3091 = vpow2.f32 %v840_v54  ;;  %2881 = vmatprep.subr.mxu1 %v3491_v0 }
 0x2cf   :  { %3093 = vpow2.f32 %v842_v53  ;;  %2882 = vmatpush3.msra.mxu1 %v1258_v47 }
 0x2d0   :  { %3095 = vpow2.f32 %v844_v60  ;;  %2897 = vmatprep.subr.mxu1 %v3491_v0 }
 0x2d6   :  { %v3870_v50 = vpop.eup %3081 }
 0x2d7   :  { %v3875_v55 = vpop.eup %3083  ;;  %855 = vperm.xlu0 %3064, %v3870_v50  }
 0x2d8   :  { %858 = vperm.xlu1 %3063, %v3875_v55   ;;  %v3880_v58 = vpop.eup %3085 }
 0x2d9   :  { %v3883_v61 = vpop.eup %3087 }
 0x2da   :  { %v3886_v56 = vpop.eup %3089 }
 0x2db   :  { %v3889_v62 = vpop.eup %3091 }
 0x2dc   :  { %861 = vperm.xlu1 %3063, %v3880_v58   ;;  %v3892_v59 = vpop.eup %3093 }
 0x2dd   :  { %v3895_v63 = vpop.eup %3095 }
 0x2e0   :  { %864 = vperm.xlu1 %3063, %v3883_v61  }
 0x2e4   :  { %867 = vperm.xlu1 %3063, %v3886_v56  }
 0x2e8   :  { %870 = vperm.xlu1 %3063, %v3889_v62  }
 0x2ec   :  { %873 = vperm.xlu1 %3063, %v3892_v59  }
 0x2f0   :  { %876 = vperm.xlu1 %3063, %v3895_v63  }
 0x2fb   :  { %v3925_v51 = vpop.f32.mrf.mxu0 }
 0x2fd   :  { %v2825_v39 = vpop.f32.mrf.mxu0 }
 0x352   :  { %v856_v5 = vpop.permute.xlu0 %855 }
 0x353   :  { %v859_v1 = vpop.permute.xlu1 %858  ;;  %v881_v9 = vrot.slane %v856_v5, %v3765_v41 }
 0x354   :  { %v885_v8 = vrot.slane %v859_v1, %v3765_v41 }
 0x356   :  { %v910_v26 = vsel %vm762_vm2, %v885_v8, %v881_v9 }
 0x357   :  { %v862_v2 = vpop.permute.xlu1 %861 }
 0x358   :  { %v889_v10 = vrot.slane %v862_v2, %v3765_v41 }
 0x35a   :  { %v911_v28 = vsel %vm764_vm3, %v889_v10, %v910_v26  ;;  %v2669_v10 = vld [vmem:[%s4185_s9 + $0x48] sm:$0xff] }
 0x35b   :  { %v865_v3 = vpop.permute.xlu1 %864 }
 0x35c   :  { %v893_v19 = vrot.slane %v865_v3, %v3765_v41 }
 0x35e   :  { %v912_v31 = vsel %vm766_vm4, %v893_v19, %v911_v28  ;;  %v1085_v19 = vld [vmem:[%s4185_s9] sm:$0xff] }
 0x35f   :  { %v868_v4 = vpop.permute.xlu1 %867 }
 0x360   :  { %v897_v24 = vrot.slane %v868_v4, %v3765_v41 }
 0x362   :  { %v913_v33 = vsel %vm768_vm5, %v897_v24, %v912_v31  ;;  %v2668_v24 = vld [vmem:[%s4185_s9 + $0x40] sm:$0xff] }
 0x363   :  { %v871_v6 = vpop.permute.xlu1 %870 }
 0x364   :  { %v901_v27 = vrot.slane %v871_v6, %v3765_v41 }
 0x366   :  { %v914_v35 = vsel %vm770_vm6, %v901_v27, %v913_v33 }
 0x367   :  { %v874_v25 = vpop.permute.xlu1 %873 }
 0x368   :  { %v905_v29 = vrot.slane %v874_v25, %v3765_v41 }
 0x36a   :  { %v915_v38 = vsel %vm772_vm7, %v905_v29, %v914_v35 }
 0x36b   :  { %v877_v34 = vpop.permute.xlu1 %876 }
 0x36c   :  { %v909_v37 = vrot.slane %v877_v34, %v3765_v41  ;;  %v3918_v41 = vld [vmem:[#allocation2] sm:$0xff] }
 0x36d   :  { %2884 = vmatmul.mubr.msk.f32.vlgmr.msra.gmra.mxu1 %vm370_vm1, %v3918_v41 }
 0x36e   :  { %v916_v40 = vsel %vm774_vm8, %v909_v37, %v915_v38  ;;  %2898 = vmatpush3.msra.mxu1 %v1351_v48  ;;  %2901 = vmatprep.mubr.msk.f32.mxu1 %vm3492_vm0, %v3491_v0 }
 0x36f   :  { %v918_v44 = vsel %vm777_vm9, %v916_v40, 0.0  ;;  %2899 = vmatprep.subr.mxu1 %v3491_v0 }
 0x370   :  { %919 = vadd.xlane.f32.xlu1 %v918_v44  ;;  %2900 = vmatpush3.msra.mxu1 %v1350_v49 }
 0x371   :  { %2902 = vmatmul.mubr.msk.f32.vlgmr.msra.gmra.mxu1 %vm1176_vm12, %v3925_v51  ;;  %2915 = vmatprep.subr.mxu1 %v3491_v0 }
 0x372   :  { %2923 = vmatprep.mubr.msk.f32.mxu1 %vm3492_vm0, %v3491_v0 }
 0x3f9   :  { %v920_v52 = vpop.xlane.xlu1 %919 }
 0x3fa   :  { %v925_v54 = vrot.slane %v920_v52, %v3740_v32  ;;  %v929_v57 = vrot.slane %v920_v52, %v788_v20  ;;  %v933_v53 = vrot.slane %v920_v52, %v792_v21  ;;  %v937_v60 = vrot.slane %v920_v52, %v796_v23 }
 0x3fb   :  { %v941_v1 = vrot.slane %v920_v52, %v800_v30  ;;  %v945_v32 = vrot.slane %v920_v52, %v804_v36  ;;  %v949_v21 = vrot.slane %v920_v52, %v808_v43  ;;  %v953_v30 = vrot.slane %v920_v52, %v812_v42 }
 0x3fc   :  { %3097 = vrcp.f32 %v925_v54 }
 0x3fd   :  { %3099 = vrcp.f32 %v929_v57 }
 0x3fe   :  { %3101 = vrcp.f32 %v933_v53 }
 0x3ff   :  { %3103 = vrcp.f32 %v937_v60 }
 0x400   :  { %3105 = vrcp.f32 %v941_v1 }
 0x401   :  { %3107 = vrcp.f32 %v945_v32 }
 0x402   :  { %3109 = vrcp.f32 %v949_v21 }
 0x403   :  { %3111 = vrcp.f32 %v953_v30 }
 0x409   :  { %v3098_v2 = vpop.eup %3097 }
 0x40a   :  { %v963_v20 = vmul.f32 %v3098_v2, %v3870_v50  ;;  %v3100_v3 = vpop.eup %3099 }
 0x40b   :  { %v965_v23 = vmul.f32 %v3100_v3, %v3875_v55  ;;  %v3102_v4 = vpop.eup %3101 }
 0x40c   :  { %980 = vperm.xlu0 %3064, %v963_v20   ;;  %v967_v5 = vmul.f32 %v3102_v4, %v3880_v58  ;;  %v3104_v36 = vpop.eup %3103 }
 0x40d   :  { %v969_v50 = vmul.f32 %v3104_v36, %v3883_v61  ;;  %v3106_v6 = vpop.eup %3105  ;;  %v1088_v61 = vld [vmem:[%s4185_s9 + $0x18] sm:$0xff] }
 0x40e   :  { %v971_v43 = vmul.f32 %v3106_v6, %v3886_v56  ;;  %v3108_v8 = vpop.eup %3107  ;;  %v2671_v56 = vld [vmem:[%s4185_s9 + $0x58] sm:$0xff]  ;;  %2858 = vmatpush3.msra.mxu0 %v1088_v61 }
 0x40f   :  { %v973_v55 = vmul.f32 %v3108_v8, %v3889_v62  ;;  %v3110_v9 = vpop.eup %3109  ;;  %v1087_v62 = vld [vmem:[%s4185_s9 + $0x10] sm:$0xff]  ;;  %2916 = vmatpush3.msra.mxu1 %v2671_v56  ;;  %2859 = vmatprep.subr.mxu0 %v3491_v0 }
 0x410   :  { %985 = vperm.xlu0 %3064, %v965_v23   ;;  %v975_v22 = vmul.f32 %v3110_v9, %v3892_v59  ;;  %v3112_v42 = vpop.eup %3111  ;;  %v2670_v59 = vld [vmem:[%s4185_s9 + $0x50] sm:$0xff]  ;;  %2917 = vmatprep.subr.mxu1 %v3491_v0 }
 0x411   :  { %v977_v58 = vmul.f32 %v3112_v42, %v3895_v63  ;;  %v1086_v63 = vld [vmem:[%s4185_s9 + $0x8] sm:$0xff]  ;;  %2860 = vmatpush3.msra.mxu0 %v1087_v62  ;;  %2918 = vmatpush3.msra.mxu1 %v2670_v59 }
 0x412   :  { %2861 = vmatprep.subr.mxu0 %v3491_v0  ;;  %2919 = vmatprep.subr.mxu1 %v3491_v0 }
 0x413   :  { %2862 = vmatpush3.msra.mxu0 %v1086_v63  ;;  %2920 = vmatpush3.msra.mxu1 %v2669_v10 }
 0x414   :  { %990 = vperm.xlu0 %3064, %v967_v5   ;;  %2863 = vmatprep.subr.mxu0 %v3491_v0 }
 0x415   :  { %2921 = vmatprep.subr.mxu1 %v3491_v0  ;;  %2864 = vmatpush3.msra.mxu0 %v1085_v19 }
 0x416   :  { %2922 = vmatpush3.msra.mxu1 %v2668_v24  ;;  %2868 = vmatprep.subr.mxu0 %v3491_v0 }
 0x417   :  { %2933 = vmatprep.subr.mxu1 %v3491_v0 }
 0x418   :  { %995 = vperm.xlu0 %3064, %v969_v50  }
 0x41c   :  { %1000 = vperm.xlu0 %3064, %v971_v43  }
 0x420   :  { %1005 = vperm.xlu0 %3064, %v973_v55  }
 0x424   :  { %1010 = vperm.xlu0 %3064, %v975_v22  }
 0x428   :  { %1015 = vperm.xlu0 %3064, %v977_v58  }
 0x42d   :  { %v3987_v25 = vpop.f32.mrf.mxu1 }
 0x42f   :  { %v2885_v26 = vpop.f32.mrf.mxu1 }
 0x431   :  { %v3989_v27 = vpop.f32.mrf.mxu1 }
 0x433   :  { %v2903_v28 = vpop.f32.mrf.mxu1 }
 0x487   :  { %v981_v29 = vpop.permute.xlu0 %980 }
 0x488   :  { %v1018_v35 = vmul.f32 %v981_v29, %v3699_v7 }
 0x48a   :  { %v1026_v45 = vsel %vm370_vm1, %v1018_v35, 0.0 }
 0x48b   :  { %v986_v31 = vpop.permute.xlu0 %985  ;;  %v1027_v49 = vrot.slane %v1026_v45, 4 }
 0x48c   :  { %v1019_v33 = vmul.f32 %v986_v31, %v3704_v11 }
 0x48d   :  { %v1028_v57 = vadd.f32 %v1027_v49, %v1026_v45 }
 0x48e   :  { %v1033_v38 = vsel %vm370_vm1, %v1019_v33, 0.0 }
 0x48f   :  { %v991_v34 = vpop.permute.xlu0 %990  ;;  %v1034_v46 = vrot.slane %v1033_v38, 4  ;;  %v1029_v21 = vrot.slane %v1028_v57, 2 }
 0x490   :  { %v1020_v37 = vmul.f32 %v991_v34, %v3706_v12 }
 0x491   :  { %v1035_v52 = vadd.f32 %v1034_v46, %v1033_v38  ;;  %v1030_v8 = vadd.f32 %v1029_v21, %v1028_v57  ;;  %v1757_v57 = vld [vmem:[#allocation14 + $0x58] sm:$0xff] }
 0x492   :  { %v1040_v40 = vsel %vm370_vm1, %v1020_v37, 0.0  ;;  %v1510_v21 = vld [vmem:[#allocation14 + $0x38] sm:$0xff] }
 0x493   :  { %v996_v44 = vpop.permute.xlu0 %995  ;;  %v1041_v47 = vrot.slane %v1040_v40, 4 }
 0x494   :  { %v1021_v18 = vmul.f32 %v996_v44, %v3713_v13  ;;  %v1036_v13 = vrot.slane %v1035_v52, 2 }
 0x495   :  { %v1042_v12 = vadd.f32 %v1041_v47, %v1040_v40 }
 0x496   :  { %v1047_v48 = vsel %vm370_vm1, %v1021_v18, 0.0  ;;  %v1037_v36 = vadd.f32 %v1036_v13, %v1035_v52  ;;  %v1755_v13 = vld [vmem:[#allocation14 + $0x48] sm:$0xff] }
 0x497   :  { %v1048_v11 = vrot.slane %v1047_v48, 4  ;;  %v1001_v39 = vpop.permute.xlu0 %1000  ;;  %v1043_v20 = vrot.slane %v1042_v12, 2 }
 0x498   :  { %v1022_v7 = vmul.f32 %v1001_v39, %v3715_v14  ;;  %v1038_v61 = vrot.slane %v1037_v36, 1 }
 0x499   :  { %v1049_v53 = vadd.f32 %v1048_v11, %v1047_v48  ;;  %v1044_v6 = vadd.f32 %v1043_v20, %v1042_v12  ;;  %v1084_v12 = vld [vmem:[#allocation13 + $0x8] sm:$0xff]  ;;  %v1754_v20 = vld [vmem:[#allocation14 + $0x40] sm:$0xff] }
 0x49a   :  { %v1054_v54 = vsel %vm370_vm1, %v1022_v7, 0.0  ;;  %v1039_v28 = vadd.f32 %v1038_v61, %v1037_v36  ;;  %v1932_v36 = vld [vmem:[#allocation20 + $0x18] sm:$0xff]  ;;  %v2105_v61 = vld [vmem:[#allocation20 + $0x28] sm:$0xff] }
 0x49b   :  { %v1055_v60 = vrot.slane %v1054_v54, 4  ;;  %v1006_v1 = vpop.permute.xlu0 %1005  ;;  %v1050_v23 = vrot.slane %v1049_v53, 2  ;;  %v1045_v59 = vrot.slane %v1044_v6, 1 }
 0x49c   :  { %v1023_v2 = vmul.f32 %v1006_v1, %v3721_v15  ;;  %v1756_v1 = vld [vmem:[#allocation14 + $0x50] sm:$0xff] }
 0x49d   :  { %v1056_v32 = vadd.f32 %v1055_v60, %v1054_v54  ;;  %v1051_v55 = vadd.f32 %v1050_v23, %v1049_v53  ;;  %v1046_v34 = vadd.f32 %v1045_v59, %v1044_v6  ;;  %v1083_v53 = vld [vmem:[#allocation13] sm:$0xff]  ;;  %v1931_v6 = vld [vmem:[#allocation20 + $0x10] sm:$0xff] }
 0x49e   :  { %v1061_v3 = vsel %vm370_vm1, %v1023_v2, 0.0  ;;  %v2661_v60 = vld [vmem:[%s4185_s9 + $0x38] sm:$0xff]  ;;  %v2660_v2 = vld [vmem:[%s4185_s9 + $0x30] sm:$0xff]  ;;  %v2279_v59 = vld [vmem:[#allocation20 + $0x50] sm:$0xff] }
 0x49f   :  { %v1062_v4 = vrot.slane %v1061_v3, 4  ;;  %v1011_v30 = vpop.permute.xlu0 %1010  ;;  %v1057_v14 = vrot.slane %v1056_v32, 2  ;;  %v1052_v10 = vrot.slane %v1051_v55, 1  ;;  %v1509_v23 = vld [vmem:[#allocation14 + $0x30] sm:$0xff] }
 0x4a0   :  { %v1024_v5 = vmul.f32 %v1011_v30, %v3723_v16  ;;  %v1031_v16 = vrot.slane %v1030_v8, 1  ;;  %v1507_v30 = vld [vmem:[#allocation14 + $0x20] sm:$0xff] }
 0x4a1   :  { %v1063_v50 = vadd.f32 %v1062_v4, %v1061_v3  ;;  %v1058_v42 = vadd.f32 %v1057_v14, %v1056_v32  ;;  %v1053_v37 = vadd.f32 %v1052_v10, %v1051_v55  ;;  %v2659_v32 = vld [vmem:[%s4185_s9 + $0x28] sm:$0xff]  ;;  %v2658_v3 = vld [vmem:[%s4185_s9 + $0x20] sm:$0xff]  ;;  %v1508_v4 = vld [vmem:[#allocation14 + $0x28] sm:$0xff] }
 0x4a2   :  { %v1068_v43 = vsel %vm370_vm1, %v1024_v5, 0.0  ;;  %v1032_v35 = vadd.f32 %v1031_v16, %v1030_v8  ;;  %v1598_v14 = vld [vmem:[#allocation13 + $0x28] sm:$0xff]  ;;  %v1597_v5 = vld [vmem:[#allocation13 + $0x20] sm:$0xff]  ;;  %v2277_v16 = vld [vmem:[#allocation20 + $0x40] sm:$0xff] }
 0x4a3   :  { %v1064_v15 = vrot.slane %v1063_v50, 2  ;;  %v1069_v9 = vrot.slane %v1068_v43, 4  ;;  %v1016_v22 = vpop.permute.xlu0 %1015  ;;  %v1059_v26 = vrot.slane %v1058_v42, 1  ;;  %v1930_v8 = vld [vmem:[#allocation20 + $0x8] sm:$0xff] }
 0x4a4   :  { %v1025_v58 = vmul.f32 %v1016_v22, %v3729_v17  ;;  %v1097_v44 = vsel %vm762_vm2, %v1039_v28, %v1032_v35  ;;  %v1846_v55 = vld [vmem:[#allocation19 + $0x8] sm:$0xff]  ;;  %v4076_v22 = vld [vmem:[#allocation2 + $0x8] sm:$0xff] }
 0x4a5   :  { %v1065_v56 = vadd.f32 %v1064_v15, %v1063_v50  ;;  %v1070_v62 = vadd.f32 %v1069_v9, %v1068_v43  ;;  %v1060_v40 = vadd.f32 %v1059_v26, %v1058_v42  ;;  %v1098_v46 = vsel %vm764_vm3, %v1046_v34, %v1097_v44  ;;  %v1848_v50 = vld [vmem:[#allocation19 + $0x18] sm:$0xff]  ;;  %v1847_v43 = vld [vmem:[#allocation19 + $0x10] sm:$0xff]  ;;  %v1929_v15 = vld [vmem:[#allocation20] sm:$0xff] }
 0x4a6   :  { %v1075_v63 = vsel %vm370_vm1, %v1025_v58, 0.0  ;;  %v1099_v48 = vsel %vm766_vm4, %v1053_v37, %v1098_v46  ;;  %v1845_v9 = vld [vmem:[#allocation19] sm:$0xff]  ;;  %v2107_v42 = vld [vmem:[#allocation20 + $0x38] sm:$0xff]  ;;  %v2106_v58 = vld [vmem:[#allocation20 + $0x30] sm:$0xff] }
 0x4a7   :  { %v1071_v19 = vrot.slane %v1070_v62, 2  ;;  %v1076_v24 = vrot.slane %v1075_v63, 4  ;;  %v1066_v29 = vrot.slane %v1065_v56, 1  ;;  %v1100_v11 = vsel %vm768_vm5, %v1060_v40, %v1099_v48  ;;  %v2665_v48 = vld [vmem:[#allocation17 + $0x1] ss:$0 sm:$0xff] }
 0x4a9   :  { %v1072_v31 = vadd.f32 %v1071_v19, %v1070_v62  ;;  %v1077_v33 = vadd.f32 %v1076_v24, %v1075_v63  ;;  %v1067_v45 = vadd.f32 %v1066_v29, %v1065_v56  ;;  %v2104_v56 = vld [vmem:[#allocation20 + $0x20] sm:$0xff]  ;;  %v2280_v62 = vld [vmem:[#allocation20 + $0x58] sm:$0xff]  ;;  %v2278_v63 = vld [vmem:[#allocation20 + $0x48] sm:$0xff] }
 0x4aa   :  { %v2655_v24 = vld [vmem:[#allocation17] ss:$0 sm:$0xff] }
 0x4ab   :  { %v1073_v38 = vrot.slane %v1072_v31, 1  ;;  %v1078_v17 = vrot.slane %v1077_v33, 2  ;;  %v1101_v7 = vsel %vm770_vm6, %v1067_v45, %v1100_v11 }
 0x4ad   :  { %v1079_v18 = vadd.f32 %v1078_v17, %v1077_v33  ;;  %v1074_v47 = vadd.f32 %v1073_v38, %v1072_v31  ;;  %v2654_v31 = vld [vmem:[#allocation16] ss:$0 sm:$0xff]  ;;  %v1339_v33 = vadd.f32 %v2655_v24, %v3987_v25 }
 0x4af   :  { %v1080_v49 = vrot.slane %v1079_v18, 1  ;;  %v1102_v52 = vsel %vm772_vm7, %v1074_v47, %v1101_v7  ;;  %v2664_v47 = vld [vmem:[#allocation16 + $0x1] ss:$0 sm:$0xff] }
 0x4b1   :  { %v1081_v39 = vadd.f32 %v1080_v49, %v1079_v18 }
 0x4b3   :  { %v4014_v54 = vsel %vm774_vm8, %v1081_v39, %v1102_v52 }
 0x4b4   :  { %2866 = vmatmul.mubr.msk.f32.vlgmr.msra.gmra.mxu0 %vm370_vm1, %v4014_v54  ;;  %2924 = vmatmul.mubr.msk.f32.vlgmr.msra.gmra.mxu1 %vm370_vm1, %v4014_v54 }
 0x4b5   :  { %2869 = vmatpush3.msra.mxu0 %v1084_v12  ;;  %2872 = vmatprep.mubr.msk.f32.mxu0 %vm3492_vm0, %v3491_v0 }
 0x4b6   :  { %2870 = vmatprep.subr.mxu0 %v3491_v0  ;;  %2934 = vmatpush3.msra.mxu1 %v1757_v57 }
 0x4b7   :  { %2871 = vmatpush3.msra.mxu0 %v1083_v53  ;;  %2935 = vmatprep.subr.mxu1 %v3491_v0 }
 0x4b8   :  { %2886 = vmatprep.subr.mxu0 %v3491_v0  ;;  %2873 = vmatmul.mubr.msk.f32.vlgmr.msra.gmra.mxu0 %vm1176_vm12, %v3925_v51 }
 0x4b9   :  { %2887 = vmatpush3.msra.mxu0 %v2661_v60  ;;  %2894 = vmatprep.mubr.msk.f32.mxu0 %vm3492_vm0, %v3491_v0 }
 0x4ba   :  { %2888 = vmatprep.subr.mxu0 %v3491_v0  ;;  %2936 = vmatpush3.msra.mxu1 %v1756_v1  ;;  %v2675_v1 = vld [vmem:[#allocation17 + $0x2] ss:$0 sm:$0xff] }
 0x4bb   :  { %2889 = vmatpush3.msra.mxu0 %v2660_v2  ;;  %2937 = vmatprep.subr.mxu1 %v3491_v0 }
 0x4bc   :  { %2890 = vmatprep.subr.mxu0 %v3491_v0  ;;  %2938 = vmatpush3.msra.mxu1 %v1755_v13 }
 0x4bd   :  { %2891 = vmatpush3.msra.mxu0 %v2659_v32  ;;  %2939 = vmatprep.subr.mxu1 %v3491_v0 }
 0x4be   :  { %2892 = vmatprep.subr.mxu0 %v3491_v0  ;;  %2940 = vmatpush3.msra.mxu1 %v1754_v20  ;;  %v2674_v20 = vld [vmem:[#allocation16 + $0x2] ss:$0 sm:$0xff] }
 0x4bf   :  { %2893 = vmatpush3.msra.mxu0 %v2658_v3  ;;  %2941 = vmatprep.mubr.msk.f32.mxu1 %vm3492_vm0, %v3491_v0 }
 0x4c0   :  { %2895 = vmatmul.mubr.msk.f32.vlgmr.msra.gmra.mxu0 %vm370_vm1, %v4014_v54  ;;  %2904 = vmatprep.subr.mxu0 %v3491_v0 }
 0x4c1   :  { %2905 = vmatpush3.msra.mxu0 %v1510_v21  ;;  %2912 = vmatprep.mubr.msk.f32.mxu0 %vm3492_vm0, %v3491_v0 }
 0x4c2   :  { %2906 = vmatprep.subr.mxu0 %v3491_v0  ;;  %2942 = vmatmul.mubr.msk.f32.vlgmr.msra.gmra.mxu1 %vm370_vm1, %v3918_v41 }
 0x4c3   :  { %2907 = vmatpush3.msra.mxu0 %v1509_v23  ;;  %2955 = vmatprep.subr.mxu1 %v3491_v0 }
 0x4c4   :  { %2908 = vmatprep.subr.mxu0 %v3491_v0  ;;  %2963 = vmatprep.mubr.msk.f32.mxu1 %vm3492_vm0, %v3491_v0 }
 0x4c5   :  { %2909 = vmatpush3.msra.mxu0 %v1508_v4  ;;  %2956 = vmatpush3.msra.mxu1 %v1932_v36 }
 0x4c6   :  { %2910 = vmatprep.subr.mxu0 %v3491_v0  ;;  %2957 = vmatprep.subr.mxu1 %v3491_v0 }
 0x4c7   :  { %2911 = vmatpush3.msra.mxu0 %v1507_v30  ;;  %2958 = vmatpush3.msra.mxu1 %v1931_v6 }
 0x4c8   :  { %2913 = vmatmul.mubr.msk.f32.vlgmr.msra.gmra.mxu0 %vm370_vm1, %v3918_v41  ;;  %2926 = vmatprep.subr.mxu0 %v3491_v0 }
 0x4c9   :  { %2927 = vmatpush3.msra.mxu0 %v1598_v14  ;;  %2930 = vmatprep.mubr.msk.f32.mxu0 %vm3492_vm0, %v3491_v0 }
 0x4ca   :  { %2928 = vmatprep.subr.mxu0 %v3491_v0  ;;  %2959 = vmatprep.subr.mxu1 %v3491_v0 }
 0x4cb   :  { %2929 = vmatpush3.msra.mxu0 %v1597_v5  ;;  %2960 = vmatpush3.msra.mxu1 %v1930_v8  ;;  %v2023_v8 = vld [vmem:[#allocation19 + $0x30] sm:$0xff] }
 0x4cc   :  { %2931 = vmatmul.mubr.msk.f32.vlgmr.msra.gmra.mxu0 %vm1176_vm12, %v3925_v51  ;;  %2944 = vmatprep.subr.mxu0 %v3491_v0 }
 0x4cd   :  { %2952 = vmatprep.mubr.msk.f32.mxu0 %vm3492_vm0, %v3491_v0  ;;  %2945 = vmatpush3.msra.mxu0 %v1848_v50 }
 0x4ce   :  { %2946 = vmatprep.subr.mxu0 %v3491_v0  ;;  %2961 = vmatprep.subr.mxu1 %v3491_v0 }
 0x4cf   :  { %2947 = vmatpush3.msra.mxu0 %v1847_v43  ;;  %2962 = vmatpush3.msra.mxu1 %v1929_v15  ;;  %v2024_v43 = vld [vmem:[#allocation19 + $0x38] sm:$0xff]  ;;  %v2021_v15 = vld [vmem:[#allocation19 + $0x20] sm:$0xff] }
 0x4d0   :  { %2948 = vmatprep.subr.mxu0 %v3491_v0  ;;  %2964 = vmatmul.mubr.msk.f32.vlgmr.msra.gmra.mxu1 %vm370_vm1, %v4076_v22 }
 0x4d1   :  { %2949 = vmatpush3.msra.mxu0 %v1846_v55  ;;  %2977 = vmatprep.subr.mxu1 %v3491_v0  ;;  %v2022_v55 = vld [vmem:[#allocation19 + $0x28] sm:$0xff] }
 0x4d2   :  { %2950 = vmatprep.subr.mxu0 %v3491_v0  ;;  %2985 = vmatprep.mubr.msk.f32.mxu1 %vm3492_vm0, %v3491_v0 }
 0x4d3   :  { %2951 = vmatpush3.msra.mxu0 %v1845_v9  ;;  %2978 = vmatpush3.msra.mxu1 %v2107_v42  ;;  %v2196_v9 = vld [vmem:[#allocation19 + $0x50] sm:$0xff]  ;;  %v2195_v42 = vld [vmem:[#allocation19 + $0x48] sm:$0xff] }
 0x4d4   :  { %2966 = vmatprep.subr.mxu0 %v3491_v0  ;;  %2979 = vmatprep.subr.mxu1 %v3491_v0 }
 0x4d5   :  { %2980 = vmatpush3.msra.mxu1 %v2106_v58  ;;  %v2194_v58 = vld [vmem:[#allocation19 + $0x40] sm:$0xff] }
 0x4d6   :  { %2981 = vmatprep.subr.mxu1 %v3491_v0 }
 0x4d7   :  { %2982 = vmatpush3.msra.mxu1 %v2105_v61  ;;  %v2375_v61 = vld [vmem:[#allocation23 + $0x18] sm:$0xff] }
 0x4d8   :  { %2983 = vmatprep.subr.mxu1 %v3491_v0 }
 0x4d9   :  { %2984 = vmatpush3.msra.mxu1 %v2104_v56  ;;  %v2374_v56 = vld [vmem:[#allocation23 + $0x10] sm:$0xff] }
 0x4da   :  { %2986 = vmatmul.mubr.msk.f32.vlgmr.msra.gmra.mxu1 %vm370_vm1, %v4076_v22  ;;  %2999 = vmatprep.subr.mxu1 %v3491_v0 }
 0x4db   :  { %3007 = vmatprep.mubr.msk.f32.mxu1 %vm3492_vm0, %v3491_v0  ;;  %3000 = vmatpush3.msra.mxu1 %v2280_v62  ;;  %v2373_v62 = vld [vmem:[#allocation23 + $0x8] sm:$0xff] }
 0x4dc   :  { %3001 = vmatprep.subr.mxu1 %v3491_v0 }
 0x4dd   :  { %3002 = vmatpush3.msra.mxu1 %v2279_v59  ;;  %v2372_v59 = vld [vmem:[#allocation23] sm:$0xff] }
 0x4de   :  { %3003 = vmatprep.subr.mxu1 %v3491_v0 }
 0x4df   :  { %3004 = vmatpush3.msra.mxu1 %v2278_v63  ;;  %v2520_v63 = vld [vmem:[%s4195_s19 + $0x8] sm:$0xff] }
 0x4e0   :  { %3005 = vmatprep.subr.mxu1 %v3491_v0 }
 0x4e1   :  { %3006 = vmatpush3.msra.mxu1 %v2277_v16  ;;  %v2519_v16 = vld [vmem:[%s4195_s19] sm:$0xff] }
 0x4e2   :  { %3008 = vmatmul.mubr.msk.f32.vlgmr.msra.gmra.mxu1 %vm370_vm1, %v4076_v22  ;;  %3021 = vmatprep.subr.mxu1 %v3491_v0 }
 0x4e3   :  { %3029 = vmatprep.mubr.msk.f32.mxu1 %vm3492_vm0, %v3491_v0 }
 0x574   :  { %v1172_v10 = vpop.f32.mrf.mxu0  ;;  %v1670_v19 = vpop.f32.mrf.mxu1 }
 0x576   :  { %v2867_v26 = vpop.f32.mrf.mxu0  ;;  %v2925_v28 = vpop.f32.mrf.mxu1 }
 0x578   :  { %v1246_v29 = vpop.f32.mrf.mxu0 }
 0x579   :  { %v1247_v34 = vadd.f32 %v1246_v29, %v1172_v10  ;;  %v2371_v29 = vld [vmem:[#allocation22 + $0x18] sm:$0xff] }
 0x57a   :  { %v2874_v35 = vpop.f32.mrf.mxu0  ;;  %3022 = vmatpush3.msra.mxu1 %v2371_v29 }
 0x57b   :  { %v1257_v37 = vadd.f32 %v2654_v31, %v1247_v34  ;;  %v2370_v31 = vld [vmem:[#allocation22 + $0x10] sm:$0xff]  ;;  %3023 = vmatprep.subr.mxu1 %v3491_v0  ;;  %v2368_v34 = vld [vmem:[#allocation22] sm:$0xff]  ;;  %v2677_v35 = vld [vmem:[%s4191_s15] ss:$0 sm:$0xff] }
 0x57c   :  { %3024 = vmatpush3.msra.mxu1 %v2370_v31 }
 0x57d   :  { %v1342_v38 = vadd.f32 %v1339_v33, %v1257_v37  ;;  %v2369_v33 = vld [vmem:[#allocation22 + $0x8] sm:$0xff]  ;;  %3025 = vmatprep.subr.mxu1 %v3491_v0 }
 0x57e   :  { %3026 = vmatpush3.msra.mxu1 %v2369_v33 }
 0x57f   :  { %v2657_v17 = vmul.f32 -1.442695, %v1342_v38  ;;  %3027 = vmatprep.subr.mxu1 %v3491_v0 }
 0x580   :  { %v1423_v40 = vpop.f32.mrf.mxu0  ;;  %3028 = vmatpush3.msra.mxu1 %v2368_v34 }
 0x581   :  { %3113 = vpow2.f32 %v2657_v17  ;;  %v1494_v46 = vadd.f32 %v3989_v27, %v1423_v40 }
 0x582   :  { %v2896_v44 = vpop.f32.mrf.mxu0  ;;  %v1832_v45 = vpop.f32.mrf.mxu1 }
 0x583   :  { %v1505_v11 = vadd.f32 %v2664_v47, %v1494_v46  ;;  %v1833_v13 = vadd.f32 %v2675_v1, %v1832_v45  ;;  %v2686_v45 = vld [vmem:[%s4192_s16 + $0x1] ss:$0 sm:$0xff] }
 0x584   :  { %v2943_v18 = vpop.f32.mrf.mxu1 }
 0x588   :  { %v1585_v49 = vpop.f32.mrf.mxu0 }
 0x589   :  { %v1586_v39 = vadd.f32 %v2665_v48, %v1585_v49 }
 0x58a   :  { %v2914_v7 = vpop.f32.mrf.mxu0 }
 0x58b   :  { %v1589_v52 = vadd.f32 %v1586_v39, %v1505_v11 }
 0x58c   :  { %v1740_v25 = vpop.f32.mrf.mxu0 }
 0x58d   :  { %v2667_v12 = vmul.f32 -1.442695, %v1589_v52  ;;  %v1741_v2 = vadd.f32 %v1740_v25, %v1670_v19 }
 0x58e   :  { %v3114_v57 = vpop.eup %3113  ;;  %v2932_v53 = vpop.f32.mrf.mxu0 }
 0x58f   :  { %v1346_v60 = vadd.f32 1.0, %v3114_v57  ;;  %3115 = vpow2.f32 %v2667_v12  ;;  %v1752_v21 = vadd.f32 %v2674_v20, %v1741_v2 }
 0x590   :  { %v2009_v10 = vpop.f32.mrf.mxu1 }
 0x591   :  { %3117 = vrcp.f32 %v1346_v60 }
 0x592   :  { %v2965_v19 = vpop.f32.mrf.mxu1 }
 0x59a   :  { %v2182_v24 = vpop.f32.mrf.mxu1 }
 0x59b   :  { %v2183_v46 = vadd.f32 %v2686_v45, %v2182_v24 }
 0x59c   :  { %v3116_v32 = vpop.eup %3115 }
 0x59d   :  { %v1593_v27 = vadd.f32 1.0, %v3116_v32 }
 0x59e   :  { %v3118_v3 = vpop.eup %3117 }
 0x59f   :  { %3119 = vrcp.f32 %v1593_v27  ;;  %v1836_v23 = vmul.f32 %v3118_v3, %v1833_v13  ;;  %v2693_v13 = vld [vmem:[%s4192_s16 + $0x2] ss:$0 sm:$0xff] }
 0x5a0   :  { %v2690_v27 = vld [vmem:[%s4191_s15 + $0x2] ss:$0 sm:$0xff] }
 0x5a1   :  { %v1837_v4 = vadd.f32 %v1836_v23, %v1752_v21 }
 0x5a3   :  { %3121 = vtanh.f32 %v1837_v4 }
 0x5ac   :  { %v3120_v30 = vpop.eup %3119 }
 0x5ad   :  { %v1839_v14 = vsub.f32 1.0, %v3120_v30  ;;  %v1841_v50 = vmul.f32 %v3120_v30, %v3918_v41  ;;  %v2197_v41 = vld [vmem:[#allocation19 + $0x58] sm:$0xff] }
 0x5b0   :  { %v3122_v5 = vpop.eup %3121 }
 0x5b1   :  { %v1840_v36 = vmul.f32 %v3122_v5, %v1839_v14 }
 0x5b3   :  { %v1842_v6 = vadd.f32 %v1841_v50, %v1840_v36 }
 0x5b5   :  { %2953 = vmatmul.mubr.msk.f32.vlgmr.msra.gmra.mxu0 %vm370_vm1, %v1842_v6  ;;  %1843 = vst.msk [vmem:[#allocation26] sm:$0xff] %vm370_vm1, %v1842_v6 }
 0x5b6   :  { %2967 = vmatpush3.msra.mxu0 %v2024_v43  ;;  %2974 = vmatprep.mubr.msk.f32.mxu0 %vm3492_vm0, %v3491_v0 }
 0x5b7   :  { %2968 = vmatprep.subr.mxu0 %v3491_v0 }
 0x5b8   :  { %2969 = vmatpush3.msra.mxu0 %v2023_v8 }
 0x5b9   :  { %2970 = vmatprep.subr.mxu0 %v3491_v0 }
 0x5ba   :  { %2971 = vmatpush3.msra.mxu0 %v2022_v55 }
 0x5bb   :  { %2972 = vmatprep.subr.mxu0 %v3491_v0 }
 0x5bc   :  { %2973 = vmatpush3.msra.mxu0 %v2021_v15 }
 0x5bd   :  { %2975 = vmatmul.mubr.msk.f32.vlgmr.msra.gmra.mxu0 %vm370_vm1, %v1842_v6  ;;  %2988 = vmatprep.subr.mxu0 %v3491_v0 }
 0x5be   :  { %2989 = vmatpush3.msra.mxu0 %v2197_v41  ;;  %2996 = vmatprep.mubr.msk.f32.mxu0 %vm3492_vm0, %v3491_v0 }
 0x5bf   :  { %2990 = vmatprep.subr.mxu0 %v3491_v0 }
 0x5c0   :  { %2991 = vmatpush3.msra.mxu0 %v2196_v9 }
 0x5c1   :  { %2992 = vmatprep.subr.mxu0 %v3491_v0 }
 0x5c2   :  { %2993 = vmatpush3.msra.mxu0 %v2195_v42 }
 0x5c3   :  { %2994 = vmatprep.subr.mxu0 %v3491_v0 }
 0x5c4   :  { %2995 = vmatpush3.msra.mxu0 %v2194_v58 }
 0x5c5   :  { %2997 = vmatmul.mubr.msk.f32.vlgmr.msra.gmra.mxu0 %vm370_vm1, %v1842_v6  ;;  %3010 = vmatprep.subr.mxu0 %v3491_v0 }
 0x5c6   :  { %3011 = vmatpush3.msra.mxu0 %v2375_v61  ;;  %3018 = vmatprep.mubr.msk.f32.mxu0 %vm3492_vm0, %v3491_v0 }
 0x5c7   :  { %3012 = vmatprep.subr.mxu0 %v3491_v0 }
 0x5c8   :  { %3013 = vmatpush3.msra.mxu0 %v2374_v56 }
 0x5c9   :  { %3014 = vmatprep.subr.mxu0 %v3491_v0 }
 0x5ca   :  { %3015 = vmatpush3.msra.mxu0 %v2373_v62 }
 0x5cb   :  { %3016 = vmatprep.subr.mxu0 %v3491_v0 }
 0x5cc   :  { %3017 = vmatpush3.msra.mxu0 %v2372_v59 }
 0x5cd   :  { %3019 = vmatmul.mubr.msk.f32.vlgmr.msra.gmra.mxu0 %vm370_vm1, %v4014_v54  ;;  %3032 = vmatprep.subr.mxu0 %v3491_v0  ;;  %v2987_v54 = vpop.f32.mrf.mxu1 }
 0x5ce   :  { %3033 = vmatpush3.msra.mxu0 %v2520_v63  ;;  %3036 = vmatprep.mubr.msk.f32.mxu0 %vm3492_vm0, %v3491_v0 }
 0x5cf   :  { %3034 = vmatprep.subr.mxu0 %v3491_v0  ;;  %v2355_v26 = vpop.f32.mrf.mxu1  ;;  %v2683_v0 = vld [vmem:[%s4191_s15 + $0x1] ss:$0 sm:$0xff] }
 0x5d0   :  { %3035 = vmatpush3.msra.mxu0 %v2519_v16  ;;  %v2356_v20 = vadd.f32 %v2693_v13, %v2355_v26 }
 0x5d1   :  { %3037 = vmatmul.mubr.msk.f32.vlgmr.msra.gmra.mxu0 %vm1176_vm12, %v3925_v51  ;;  %v3009_v28 = vpop.f32.mrf.mxu1  ;;  %v2679_v51 = vld [vmem:[%s4192_s16] ss:$0 sm:$0xff]  ;;  %s3495_s16 = smov [#allocation26]  }
 0x5d2   :  { %v2010_v37 = vadd.f32 %v2679_v51, %v2009_v10  ;;  %s2616_s3 = sshll.u32 %s3495_s16, 4  ;;  %s2617_s3 = int_to_ptr.vmem [resolvable:$true] %s2616_s3 }
 0x5d3   :  { %s3413_s15 = scalar_lea.vmem %s2617_s3, 256  ;;  %p3418_p1 = scmp.lt.s32.totalorder %s2617_s3, %s2617_s3 }
 0x5d4   :  { %p3414_p0 = scmp.ne.s32.totalorder %s2617_s3, %s3413_s15  ;;  %p3419_p2 = scmp.lt.s32.totalorder %s3413_s15, %s3413_s15 }
 0x5d6   :  { %p3420_p3 = por %p3419_p2, %p3418_p1 }
 0x5d8   :  { %p3421_p4 = pnand %p3420_p3, %p3414_p0 }
 0x675   :  { %v1925_v38 = vpop.f32.mrf.mxu0 }
 0x676   :  { %v1926_v17 = vadd.f32 %v2677_v35, %v1925_v38 }
 0x677   :  { %v2954_v40 = vpop.f32.mrf.mxu0 }
 0x678   :  { %v2013_v44 = vadd.f32 %v2010_v37, %v1926_v17 }
 0x67a   :  { %v2681_v18 = vmul.f32 -1.442695, %v2013_v44 }
 0x67c   :  { %3123 = vpow2.f32 %v2681_v18 }
 0x67d   :  { %v2099_v47 = vpop.f32.mrf.mxu0 }
 0x67e   :  { %v2100_v48 = vadd.f32 %v2683_v0, %v2099_v47 }
 0x67f   :  { %v2976_v49 = vpop.f32.mrf.mxu0 }
 0x680   :  { %v2186_v11 = vadd.f32 %v2183_v46, %v2100_v48 }
 0x682   :  { %v2688_v39 = vmul.f32 -1.442695, %v2186_v11 }
 0x684   :  { %3125 = vpow2.f32 %v2688_v39 }
 0x685   :  { %v2272_v7 = vpop.f32.mrf.mxu0 }
 0x686   :  { %v2273_v21 = vadd.f32 %v2690_v27, %v2272_v7 }
 0x687   :  { %v2998_v52 = vpop.f32.mrf.mxu0 }
 0x689   :  { %v3124_v25 = vpop.eup %3123 }
 0x68a   :  { %v2017_v12 = vadd.f32 1.0, %v3124_v25 }
 0x68c   :  { %3127 = vrcp.f32 %v2017_v12 }
 0x68d   :  { %v2442_v57 = vpop.f32.mrf.mxu0 }
 0x68f   :  { %v3020_v53 = vpop.f32.mrf.mxu0 }
 0x691   :  { %v2587_v60 = vpop.f32.mrf.mxu0  ;;  %v3126_v1 = vpop.eup %3125 }
 0x692   :  { %v2190_v32 = vadd.f32 1.0, %v3126_v1 }
 0x693   :  { %v3038_v2 = vpop.f32.mrf.mxu0 }
 0x694   :  { %3129 = vrcp.f32 %v2190_v32 }
 0x699   :  { %v3128_v3 = vpop.eup %3127 }
 0x69a   :  { %v2359_v23 = vmul.f32 %v3128_v3, %v2356_v20 }
 0x69c   :  { %v2360_v4 = vadd.f32 %v2359_v23, %v2273_v21 }
 0x69e   :  { %3131 = vtanh.f32 %v2360_v4 }
 0x6a1   :  { %v3130_v30 = vpop.eup %3129 }
 0x6a2   :  { %v2362_v14 = vsub.f32 1.0, %v3130_v30  ;;  %v2364_v50 = vmul.f32 %v3130_v30, %v4076_v22 }
 0x6ab   :  { %v3132_v5 = vpop.eup %3131 }
 0x6ac   :  { %v2363_v36 = vmul.f32 %v3132_v5, %v2362_v14 }
 0x6ae   :  { %v2365_v6 = vadd.f32 %v2364_v50, %v2363_v36 }
 0x6b0   :  { %3030 = vmatmul.mubr.msk.f32.vlgmr.msra.gmra.mxu1 %vm370_vm1, %v2365_v6  ;;  %2367 = vst.msk [vmem:[#allocation26 + $0x8] sm:$0xff] %vm370_vm1, %v2365_v6 }
 0x6b1   :  { %3424 = shalt.err (!%p3421_p4)
}
 0x6b2   :  { %2622 = dma.vmem_to_hbm [thread:$0]  %s2617_s3, 256, %s4198_s22, [#allocation27], %s3475_s0, %s3475_s0, %s3476_s23  }
 0x6b3   :  { %v2698_v55 = vld [vmem:[%s4196_s20] ss:$0 sm:$0xff]  ;;  %s3496_s13 = smov [#allocation25]  }
 0x6b4   :  { %s2607_s14 = sshll.u32 %s3496_s13, 4  ;;  %s2608_s14 = int_to_ptr.vmem [resolvable:$true] %s2607_s14 }
 0x6b5   :  { %s3433_s29 = scalar_lea.vmem %s2608_s14, 128  ;;  %p3438_p6 = scmp.lt.s32.totalorder %s2608_s14, %s2608_s14 }
 0x6b6   :  { %p3434_p5 = scmp.ne.s32.totalorder %s2608_s14, %s3433_s29  ;;  %p3439_p7 = scmp.lt.s32.totalorder %s3433_s29, %s3433_s29 }
 0x6b8   :  { %p3440_p8 = por %p3439_p7, %p3438_p6 }
 0x6ba   :  { %p3441_p9 = pnand %p3440_p8, %p3434_p5 }
 0x770   :  { %v2515_v22 = vpop.f32.mrf.mxu1 }
 0x771   :  { %v2516_v43 = vadd.f32 %v2515_v22, %v2442_v57 }
 0x772   :  { %v3031_v8 = vpop.f32.mrf.mxu1 }
 0x773   :  { %v2591_v15 = vadd.f32 %v2587_v60, %v2516_v43 }
 0x775   :  { %v2599_v41 = vadd.f32 %v2698_v55, %v2591_v15 }
 0x777   :  { %2600 = vst [vmem:[#allocation25] sm:$0xff] %v2599_v41 }
 0x778   :  { %3444 = shalt.err (!%p3441_p9)
}
 0x779   :  { %2610 = dma.vmem_to_hbm [thread:$0]  %s2608_s14, 128, %s4197_s21, [#allocation4]  }
 0x77a   :  { %3469 = dma.done.wait [#allocation4], 128  }
 0x77b   :  { %3470 = vsyncadd [#allocation4], 4294967168 }
 0x77c   :  { %3471 = dma.done.wait [#allocation27], 256  }
 0x77d   :  { %3472 = vsyncadd [#allocation27], 4294967040 }
 0x77e   :  { %2629 = vsyncpa [#allocation3], 1 }
 0x77f   :  { %2630 = vsyncpa [#allocation6], 1 }
 0x780   :  { %2631 = vsyncpa [#allocation9], 1 }
 0x781   :  { %2632 = vsyncpa [#allocation12], 1 }
 0x782   :  { %2633 = vsyncpa [#allocation15], 1 }
 0x783   :  { %2634 = vsyncpa [#allocation18], 1 }
 0x784   :  { %2635 = vsyncpa [#allocation21], 1 }
 0x785   :  { %2636 = vsyncpa [#allocation24], 1 }
 0x786   :  { %2637 = vsyncpa [#allocation4], 1 }
 0x787   :  { %2638 = vsyncpa [#allocation27], 1 }

</bundles_post_ra>
